<compile_context>
chip_gen: v5e
topology: v5e:2x2
jax: 0.10.0
libtpu: 0.0.40
codegen_flags: <defaults>
</compile_context>

<pallas_src>
import jax
import jax.numpy as jnp
from jax import lax
from jax.experimental import pallas as pl

# ----- small config (consistent with the PyTorch module) ---------------------
B = 2            # batch
L = 8            # feat_len (attention length; 196 in the original)
F = 32           # feat_size (annotation vector size)
E = 16           # embedding_size
H = 32           # hidden_size
A = 16           # attn_size (bottleneck)
V = 64           # vocabulary size (voc.num_words)
NUM_LAYERS = 1
DEC_IN = E + F   # decoder_input_size (embedding concat attended feature)


def _decoder_kernel(gih_ref, h0_ref, c0_ref, uv_ref, feats_ref,
                    hslab_ref, wihf_ref, wfin_ref, head_ref,
                    probs_ref, attnw_ref, hc_ref):
    """Whole T-step decode in one invocation; h/c carried through fori_loop."""
    T = gih_ref.shape[0]

    uv = uv_ref[...]                          # (B, L, A)  b_enc + b_dec folded in
    feats = feats_ref[...]                    # (B, L, F)
    hslab = hslab_ref[...]                    # (H, 4H + A) = [w_hh | w_dec]
    wihf = wihf_ref[...]                      # (F, 4H)
    wfin = wfin_ref[...].reshape(1, 1, A)     # (1, 1, A)
    w_out = head_ref[0:H, :]                  # (H, V)
    b_out = head_ref[H:H + 1, :]              # (1, V)

    def step(t, carry):
        h_prev, c_prev = carry                # (B, H), (B, H)

        # --- single fused h_prev matmul (LSTM gates + attention projection) ---
        hproj = jnp.dot(h_prev, hslab, preferred_element_type=jnp.float32)  # (B, 4H+A)
        gh = hproj[:, :4 * H]                 # (B, 4H)  vreg-aligned slice
        wh = hproj[:, 4 * H:4 * H + A]        # (B, A)   vreg-aligned slice

        # ---------------- spatial attention (concat score) ----------------
        scored = jnp.tanh(wh[:, None, :] + uv)                    # (B, L, A)
        energies = jnp.sum(scored * wfin, axis=-1)                # (B, L); b_fin dropped
        m = jnp.max(energies, axis=-1, keepdims=True)
        e = jnp.exp(energies - m)
        inv = pl.reciprocal(jnp.sum(e, axis=-1, keepdims=True), approx=True)
        weights = e * inv                                         # (B, L)
        # weighted sum of annotation vectors on VPU/XLU (L is tiny)
        attn_feats = jnp.sum(weights[:, :, None] * feats, axis=1)  # (B, F)

        # ---------------- LSTM cell (1 layer, single step) ----------------
        # embedding contribution + (b_ih + b_hh) precomputed outside the kernel
        gates = (gih_ref[t]
                 + jnp.dot(attn_feats, wihf, preferred_element_type=jnp.float32)
                 + gh)                                            # (B, 4H)
        i_g = jax.nn.sigmoid(gates[:, 0 * H:1 * H])
        f_g = jax.nn.sigmoid(gates[:, 1 * H:2 * H])
        g_g = jnp.tanh(gates[:, 2 * H:3 * H])
        o_g = jax.nn.sigmoid(gates[:, 3 * H:4 * H])
        c_new = f_g * c_prev + i_g * g_g
        h_new = o_g * jnp.tanh(c_new)

        # ---------------- output head + exact softmax over vocab ----------------
        logits = jnp.dot(h_new, w_out, preferred_element_type=jnp.float32) + b_out
        lm = jnp.max(logits, axis=-1, keepdims=True)
        le = jnp.exp(logits - lm)
        probs = le / jnp.sum(le, axis=-1, keepdims=True)          # exact normalize

        probs_ref[t] = probs                                      # (B, V)
        attnw_ref[t] = weights                                    # (B, L)
        return (h_new, c_new)

    h_fin, c_fin = lax.fori_loop(0, T, step, (h0_ref[...], c0_ref[...]),
                                 unroll=(T <= 16))
    # Final hidden state emitted once (per-step h/c are never consumed).
    hc_ref[0] = h_fin
    hc_ref[1] = c_fin


def decoder_decode(tokens, hidden, feats, params):
    """Fused multi-step decode: one pallas_call, whole T-loop inside the kernel.

    tokens: (T, B) int32; hidden: (h, c) each (1, B, H); feats: (B, L, F).
    Returns (probs (T,B,V), final hidden, attn_weights (T,B,L,1)) -- i.e. the
    PyTorch single-step forward applied T times with the hidden state chained.
    """
    h0, c0 = hidden
    T = tokens.shape[0]
    embedded = params["embedding"][tokens]                               # (T, B, E)
    # Loop-invariant work hoisted to XLA (well-shaped batched matmuls):
    gih = (jnp.einsum('tbe,eg->tbg', embedded, params["w_ih"][:E])
           + params["b_ih"] + params["b_hh"])                            # (T, B, 4H)
    uv = (jnp.einsum('blf,fa->bla', feats, params["w_enc"])
          + params["b_enc"] + params["b_dec"])                           # (B, L, A)
    # packed h_prev slab: [w_hh | w_dec] so gh lands on lanes 0..4H-1 (aligned)
    hslab = jnp.concatenate([params["w_hh"], params["w_dec"]], axis=1)   # (H, 4H+A)
    wihf = params["w_ih"][E:]                                            # (F, 4H)
    head = jnp.concatenate([params["w_out"], params["b_out"]], axis=0)   # (H+1, V)

    probs, attnw, hc = pl.pallas_call(
        _decoder_kernel,
        out_shape=(jax.ShapeDtypeStruct((T, B, V), jnp.float32),
                   jax.ShapeDtypeStruct((T, B, L), jnp.float32),
                   jax.ShapeDtypeStruct((2, B, H), jnp.float32)),
    )(gih, h0[0], c0[0], uv, feats, hslab, wihf, params["w_fin"], head)

    new_hidden = (hc[0][None], hc[1][None])                              # (1, B, H)
    return probs, new_hidden, attnw[..., None]                           # (T, B, L, 1)


def decoder_step(inputs, hidden, feats, params):
    """Single step -- same signature/semantics as the PyTorch Decoder.forward."""
    probs, new_hidden, attnw = decoder_decode(inputs, hidden, feats, params)
    return probs[0], new_hidden, attnw[0]


def make_params(key):
    ks = jax.random.split(key, 12)

    def u(k, shape, fan_in):
        bound = 1.0 / jnp.sqrt(fan_in)
        return jax.random.uniform(k, shape, jnp.float32, -bound, bound)

    return {
        "embedding": jax.random.normal(ks[0], (V, E), jnp.float32) * 0.1,
        # SpatialAttention  (weights stored transposed: (in, out))
        "w_dec": u(ks[1], (H, A), H), "b_dec": u(ks[2], (1, A), H),
        "w_enc": u(ks[3], (F, A), F), "b_enc": u(ks[4], (1, A), F),
        "w_fin": u(ks[5], (1, A), A), "b_fin": u(ks[6], (1, 1), A),
        # LSTM (PyTorch gate order i, f, g, o), transposed to (in, 4H)
        "w_ih": u(ks[7], (DEC_IN, 4 * H), DEC_IN), "b_ih": u(ks[8], (1, 4 * H), DEC_IN),
        "w_hh": u(ks[9], (H, 4 * H), H),           "b_hh": u(ks[10], (1, 4 * H), H),
        # output head
        "w_out": u(ks[11], (H, V), H), "b_out": jnp.zeros((1, V), jnp.float32),
    }


def decoder_step_ref(inputs, hidden, feats, p):
    """Pure-JAX single-step reference mirroring the PyTorch forward."""
    h0, c0 = hidden
    emb = p["embedding"][inputs[0]]
    h0_2d, c0_2d = h0[0], c0[0]
    Wh = h0_2d @ p["w_dec"] + p["b_dec"]
    Uv = jnp.einsum("blf,fa->bla", feats, p["w_enc"]) + p["b_enc"][None]
    t = jnp.tanh(Wh[:, None, :] + Uv)
    energies = jnp.sum(t * p["w_fin"][0][None, None, :], axis=-1) + p["b_fin"][0, 0]
    w = jax.nn.softmax(energies, axis=1)
    attn = jnp.sum(w[:, :, None] * feats, axis=1)
    x = jnp.concatenate([emb, attn], axis=1)
    gates = x @ p["w_ih"] + p["b_ih"] + h0_2d @ p["w_hh"] + p["b_hh"]
    i_g = jax.nn.sigmoid(gates[:, :H]); f_g = jax.nn.sigmoid(gates[:, H:2 * H])
    g_g = jnp.tanh(gates[:, 2 * H:3 * H]); o_g = jax.nn.sigmoid(gates[:, 3 * H:])
    c1 = f_g * c0_2d + i_g * g_g
    h1 = o_g * jnp.tanh(c1)
    probs = jax.nn.softmax(h1 @ p["w_out"] + p["b_out"], axis=1)
    return probs, (h1[None], c1[None]), w[:, :, None]


if __name__ == "__main__":
    key = jax.random.PRNGKey(0)
    k_par, k_in, k_h, k_c, k_f = jax.random.split(key, 5)
    params = make_params(k_par)

    T = 4
    tokens = jax.random.randint(k_in, (T, B), 0, V, dtype=jnp.int32)          # (T, batch)
    h0 = jax.random.normal(k_h, (NUM_LAYERS, B, H), jnp.float32) * 0.1        # (1, B, H)
    c0 = jax.random.normal(k_c, (NUM_LAYERS, B, H), jnp.float32) * 0.1
    feats = jax.random.normal(k_f, (B, L, F), jnp.float32)                    # (B, L, F)

    # Fused T-step decode (one pallas_call, T-loop inside, h/c as loop carries)
    probs, (h1, c1), attn_w = decoder_decode(tokens, (h0, c0), feats, params)
    jax.block_until_ready((probs, h1, c1, attn_w))

    # Step-by-step pure-JAX reference (mirrors the PyTorch forward called T times)
    hid = (h0, c0)
    ref_probs, ref_w = [], []
    for t in range(T):
        p_t, hid, w_t = decoder_step_ref(tokens[t:t + 1], hid, feats, params)
        ref_probs.append(p_t); ref_w.append(w_t)
    r_probs = jnp.stack(ref_probs)
    r_w = jnp.stack(ref_w)
    r_h1, r_c1 = hid

    tol = 5e-3   # attention softmax uses the approximate EUP reciprocal
    assert jnp.allclose(probs, r_probs, atol=tol), "probs mismatch"
    assert jnp.allclose(h1, r_h1, atol=tol), "h mismatch"
    assert jnp.allclose(c1, r_c1, atol=tol), "c mismatch"
    assert jnp.allclose(attn_w, r_w, atol=tol), "attn weights mismatch"
    # exact softmax: probabilities sum to 1
    assert jnp.allclose(jnp.sum(probs, axis=-1), 1.0, atol=1e-5), "probs not normalized"

    # Single-step API (identical semantics to the PyTorch module's forward)
    p1, hid1, w1 = decoder_step(tokens[0:1], (h0, c0), feats, params)
    jax.block_until_ready(p1)
    assert jnp.allclose(p1, ref_probs[0], atol=tol), "single-step probs mismatch"

    print("KERNEL_OK")
</pallas_src>

<mosaic_0001>
module attributes {stable_mosaic.version = 11 : i64} {
  func.func @_decoder_kernel(%arg0: memref<4x2x128xf32, #tpu.memory_space<vmem>>, %arg1: memref<2x32xf32, #tpu.memory_space<vmem>>, %arg2: memref<2x32xf32, #tpu.memory_space<vmem>>, %arg3: memref<2x8x16xf32, #tpu.memory_space<vmem>>, %arg4: memref<2x8x32xf32, #tpu.memory_space<vmem>>, %arg5: memref<32x144xf32, #tpu.memory_space<vmem>>, %arg6: memref<32x128xf32, #tpu.memory_space<vmem>>, %arg7: memref<1x16xf32, #tpu.memory_space<vmem>>, %arg8: memref<33x64xf32, #tpu.memory_space<vmem>>, %arg9: memref<4x2x64xf32, #tpu.memory_space<vmem>>, %arg10: memref<4x2x8xf32, #tpu.memory_space<vmem>>, %arg11: memref<2x2x32xf32, #tpu.memory_space<vmem>>) attributes {dimension_semantics = [], scalar_prefetch = 0 : i64, scratch_operands = 0 : i64, tpu.core_type = #tpu.core_type<tc>} {
    %c0 = arith.constant 0 : index
    %c0_0 = arith.constant 0 : index
    %c0_1 = arith.constant 0 : index
    %0 = vector.load %arg3[%c0, %c0_0, %c0_1] : memref<2x8x16xf32, #tpu.memory_space<vmem>>, vector<2x8x16xf32>
    %c0_2 = arith.constant 0 : index
    %c0_3 = arith.constant 0 : index
    %c0_4 = arith.constant 0 : index
    %1 = vector.load %arg4[%c0_2, %c0_3, %c0_4] : memref<2x8x32xf32, #tpu.memory_space<vmem>>, vector<2x8x32xf32>
    %c0_5 = arith.constant 0 : index
    %c0_6 = arith.constant 0 : index
    %2 = vector.load %arg5[%c0_5, %c0_6] : memref<32x144xf32, #tpu.memory_space<vmem>>, vector<32x144xf32>
    %c0_7 = arith.constant 0 : index
    %c0_8 = arith.constant 0 : index
    %3 = vector.load %arg6[%c0_7, %c0_8] : memref<32x128xf32, #tpu.memory_space<vmem>>, vector<32x128xf32>
    %c0_9 = arith.constant 0 : index
    %c0_10 = arith.constant 0 : index
    %4 = vector.load %arg7[%c0_9, %c0_10] : memref<1x16xf32, #tpu.memory_space<vmem>>, vector<1x16xf32>
    %5 = vector.shape_cast %4 : vector<1x16xf32> to vector<1x1x16xf32>
    %c0_11 = arith.constant 0 : index
    %c0_12 = arith.constant 0 : index
    %6 = vector.load %arg8[%c0_11, %c0_12] : memref<33x64xf32, #tpu.memory_space<vmem>>, vector<32x64xf32>
    %c32 = arith.constant 32 : index
    %c0_13 = arith.constant 0 : index
    %7 = vector.load %arg8[%c32, %c0_13] : memref<33x64xf32, #tpu.memory_space<vmem>>, vector<1x64xf32>
    %c0_14 = arith.constant 0 : index
    %c0_15 = arith.constant 0 : index
    %8 = vector.load %arg1[%c0_14, %c0_15] : memref<2x32xf32, #tpu.memory_space<vmem>>, vector<2x32xf32>
    %c0_16 = arith.constant 0 : index
    %c0_17 = arith.constant 0 : index
    %9 = vector.load %arg2[%c0_16, %c0_17] : memref<2x32xf32, #tpu.memory_space<vmem>>, vector<2x32xf32>
    %c0_i32 = arith.constant 0 : i32
    %cst = arith.constant dense<0.000000e+00> : vector<2x144xf32>
    %10 = tpu.matmul %8, %2, %cst {dimension_numbers = #tpu.dot_dimension_numbers<[1], [0], [0], [1], [0, 0, 1, 1], [], []>} : vector<2x32xf32>, vector<32x144xf32>, vector<2x144xf32> -> vector<2x144xf32>
    %11 = vector.extract_strided_slice %10 {offsets = [0, 0], sizes = [2, 128], strides = [1, 1]} : vector<2x144xf32> to vector<2x128xf32>
    %12 = vector.extract_strided_slice %10 {offsets = [0, 128], sizes = [2, 16], strides = [1, 1]} : vector<2x144xf32> to vector<2x16xf32>
    %13 = vector.shape_cast %12 : vector<2x16xf32> to vector<2x1x16xf32>
    %14 = vector.broadcast %13 : vector<2x1x16xf32> to vector<2x8x16xf32>
    %15 = arith.addf %14, %0 : vector<2x8x16xf32>
    %16 = math.tanh %15 : vector<2x8x16xf32>
    %17 = vector.broadcast %5 : vector<1x1x16xf32> to vector<2x8x16xf32>
    %18 = arith.mulf %16, %17 : vector<2x8x16xf32>
    %cst_18 = arith.constant dense<0.000000e+00> : vector<2x8xf32>
    %19 = vector.multi_reduction <add>, %18, %cst_18 [2] : vector<2x8x16xf32> to vector<2x8xf32>
    %cst_19 = arith.constant dense<0xFF800000> : vector<2xf32>
    %20 = vector.multi_reduction <maximumf>, %19, %cst_19 [1] : vector<2x8xf32> to vector<2xf32>
    %21 = vector.shape_cast %20 : vector<2xf32> to vector<2x1xf32>
    %22 = vector.broadcast %21 : vector<2x1xf32> to vector<2x8xf32>
    %23 = arith.subf %19, %22 : vector<2x8xf32>
    %24 = math.exp %23 : vector<2x8xf32>
    %cst_20 = arith.constant dense<0.000000e+00> : vector<2xf32>
    %25 = vector.multi_reduction <add>, %24, %cst_20 [1] : vector<2x8xf32> to vector<2xf32>
    %26 = vector.shape_cast %25 : vector<2xf32> to vector<2x1xf32>
    %27 = tpu.reciprocal %26 {approx = true} : vector<2x1xf32> -> vector<2x1xf32>
    %28 = vector.broadcast %27 : vector<2x1xf32> to vector<2x8xf32>
    %29 = arith.mulf %24, %28 : vector<2x8xf32>
    %30 = vector.shape_cast %29 : vector<2x8xf32> to vector<2x8x1xf32>
    %31 = vector.broadcast %30 : vector<2x8x1xf32> to vector<2x8x32xf32>
    %32 = arith.mulf %31, %1 : vector<2x8x32xf32>
    %cst_21 = arith.constant dense<0.000000e+00> : vector<2x32xf32>
    %33 = vector.multi_reduction <add>, %32, %cst_21 [1] : vector<2x8x32xf32> to vector<2x32xf32>
    %34 = arith.index_cast %c0_i32 : i32 to index
    %c0_22 = arith.constant 0 : index
    %c0_23 = arith.constant 0 : index
    %35 = vector.load %arg0[%34, %c0_22, %c0_23] : memref<4x2x128xf32, #tpu.memory_space<vmem>>, vector<1x2x128xf32>
    %36 = vector.shape_cast %35 : vector<1x2x128xf32> to vector<2x128xf32>
    %cst_24 = arith.constant dense<0.000000e+00> : vector<2x128xf32>
    %37 = tpu.matmul %33, %3, %cst_24 {dimension_numbers = #tpu.dot_dimension_numbers<[1], [0], [0], [1], [0, 0, 1, 1], [], []>} : vector<2x32xf32>, vector<32x128xf32>, vector<2x128xf32> -> vector<2x128xf32>
    %38 = arith.addf %36, %37 : vector<2x128xf32>
    %39 = arith.addf %38, %11 : vector<2x128xf32>
    %40 = vector.extract_strided_slice %39 {offsets = [0, 0], sizes = [2, 32], strides = [1, 1]} : vector<2x128xf32> to vector<2x32xf32>
    %41 = arith.negf %40 : vector<2x32xf32>
    %42 = math.exp %41 : vector<2x32xf32>
    %cst_25 = arith.constant 1.000000e+00 : f32
    %43 = vector.broadcast %cst_25 : f32 to vector<2x32xf32>
    %44 = arith.addf %43, %42 : vector<2x32xf32>
    %45 = arith.divf %43, %44 : vector<2x32xf32>
    %46 = vector.extract_strided_slice %39 {offsets = [0, 32], sizes = [2, 32], strides = [1, 1]} : vector<2x128xf32> to vector<2x32xf32>
    %47 = arith.negf %46 : vector<2x32xf32>
    %48 = math.exp %47 : vector<2x32xf32>
    %cst_26 = arith.constant 1.000000e+00 : f32
    %49 = vector.broadcast %cst_26 : f32 to vector<2x32xf32>
    %50 = arith.addf %49, %48 : vector<2x32xf32>
    %51 = arith.divf %49, %50 : vector<2x32xf32>
    %52 = vector.extract_strided_slice %39 {offsets = [0, 64], sizes = [2, 32], strides = [1, 1]} : vector<2x128xf32> to vector<2x32xf32>
    %53 = math.tanh %52 : vector<2x32xf32>
    %54 = vector.extract_strided_slice %39 {offsets = [0, 96], sizes = [2, 32], strides = [1, 1]} : vector<2x128xf32> to vector<2x32xf32>
    %55 = arith.negf %54 : vector<2x32xf32>
    %56 = math.exp %55 : vector<2x32xf32>
    %cst_27 = arith.constant 1.000000e+00 : f32
    %57 = vector.broadcast %cst_27 : f32 to vector<2x32xf32>
    %58 = arith.addf %57, %56 : vector<2x32xf32>
    %59 = arith.divf %57, %58 : vector<2x32xf32>
    %60 = arith.mulf %51, %9 : vector<2x32xf32>
    %61 = arith.mulf %45, %53 : vector<2x32xf32>
    %62 = arith.addf %60, %61 : vector<2x32xf32>
    %63 = math.tanh %62 : vector<2x32xf32>
    %64 = arith.mulf %59, %63 : vector<2x32xf32>
    %cst_28 = arith.constant dense<0.000000e+00> : vector<2x64xf32>
    %65 = tpu.matmul %64, %6, %cst_28 {dimension_numbers = #tpu.dot_dimension_numbers<[1], [0], [0], [1], [0, 0, 1, 1], [], []>} : vector<2x32xf32>, vector<32x64xf32>, vector<2x64xf32> -> vector<2x64xf32>
    %66 = vector.broadcast %7 : vector<1x64xf32> to vector<2x64xf32>
    %67 = arith.addf %65, %66 : vector<2x64xf32>
    %cst_29 = arith.constant dense<0xFF800000> : vector<2xf32>
    %68 = vector.multi_reduction <maximumf>, %67, %cst_29 [1] : vector<2x64xf32> to vector<2xf32>
    %69 = vector.shape_cast %68 : vector<2xf32> to vector<2x1xf32>
    %70 = vector.broadcast %69 : vector<2x1xf32> to vector<2x64xf32>
    %71 = arith.subf %67, %70 : vector<2x64xf32>
    %72 = math.exp %71 : vector<2x64xf32>
    %cst_30 = arith.constant dense<0.000000e+00> : vector<2xf32>
    %73 = vector.multi_reduction <add>, %72, %cst_30 [1] : vector<2x64xf32> to vector<2xf32>
    %74 = vector.shape_cast %73 : vector<2xf32> to vector<2x1xf32>
    %75 = vector.broadcast %74 : vector<2x1xf32> to vector<2x64xf32>
    %76 = arith.divf %72, %75 : vector<2x64xf32>
    %77 = arith.index_cast %c0_i32 : i32 to index
    %c0_31 = arith.constant 0 : index
    %c0_32 = arith.constant 0 : index
    %78 = vector.load %arg9[%77, %c0_31, %c0_32] : memref<4x2x64xf32, #tpu.memory_space<vmem>>, vector<1x2x64xf32>
    %79 = vector.shape_cast %78 : vector<1x2x64xf32> to vector<2x64xf32>
    %80 = vector.shape_cast %76 : vector<2x64xf32> to vector<1x2x64xf32>
    tpu.vector_store %arg9[%77, %c0_31, %c0_32], %80 {strides = array<i32>} : memref<4x2x64xf32, #tpu.memory_space<vmem>>, vector<1x2x64xf32>,
    %81 = arith.index_cast %c0_i32 : i32 to index
    %c0_33 = arith.constant 0 : index
    %c0_34 = arith.constant 0 : index
    %82 = vector.load %arg10[%81, %c0_33, %c0_34] : memref<4x2x8xf32, #tpu.memory_space<vmem>>, vector<1x2x8xf32>
    %83 = vector.shape_cast %82 : vector<1x2x8xf32> to vector<2x8xf32>
    %84 = vector.shape_cast %29 : vector<2x8xf32> to vector<1x2x8xf32>
    tpu.vector_store %arg10[%81, %c0_33, %c0_34], %84 {strides = array<i32>} : memref<4x2x8xf32, #tpu.memory_space<vmem>>, vector<1x2x8xf32>,
    %c1_i32 = arith.constant 1 : i32
    %cst_35 = arith.constant dense<0.000000e+00> : vector<2x144xf32>
    %85 = tpu.matmul %64, %2, %cst_35 {dimension_numbers = #tpu.dot_dimension_numbers<[1], [0], [0], [1], [0, 0, 1, 1], [], []>} : vector<2x32xf32>, vector<32x144xf32>, vector<2x144xf32> -> vector<2x144xf32>
    %86 = vector.extract_strided_slice %85 {offsets = [0, 0], sizes = [2, 128], strides = [1, 1]} : vector<2x144xf32> to vector<2x128xf32>
    %87 = vector.extract_strided_slice %85 {offsets = [0, 128], sizes = [2, 16], strides = [1, 1]} : vector<2x144xf32> to vector<2x16xf32>
    %88 = vector.shape_cast %87 : vector<2x16xf32> to vector<2x1x16xf32>
    %89 = vector.broadcast %88 : vector<2x1x16xf32> to vector<2x8x16xf32>
    %90 = arith.addf %89, %0 : vector<2x8x16xf32>
    %91 = math.tanh %90 : vector<2x8x16xf32>
    %92 = vector.broadcast %5 : vector<1x1x16xf32> to vector<2x8x16xf32>
    %93 = arith.mulf %91, %92 : vector<2x8x16xf32>
    %cst_36 = arith.constant dense<0.000000e+00> : vector<2x8xf32>
    %94 = vector.multi_reduction <add>, %93, %cst_36 [2] : vector<2x8x16xf32> to vector<2x8xf32>
    %cst_37 = arith.constant dense<0xFF800000> : vector<2xf32>
    %95 = vector.multi_reduction <maximumf>, %94, %cst_37 [1] : vector<2x8xf32> to vector<2xf32>
    %96 = vector.shape_cast %95 : vector<2xf32> to vector<2x1xf32>
    %97 = vector.broadcast %96 : vector<2x1xf32> to vector<2x8xf32>
    %98 = arith.subf %94, %97 : vector<2x8xf32>
    %99 = math.exp %98 : vector<2x8xf32>
    %cst_38 = arith.constant dense<0.000000e+00> : vector<2xf32>
    %100 = vector.multi_reduction <add>, %99, %cst_38 [1] : vector<2x8xf32> to vector<2xf32>
    %101 = vector.shape_cast %100 : vector<2xf32> to vector<2x1xf32>
    %102 = tpu.reciprocal %101 {approx = true} : vector<2x1xf32> -> vector<2x1xf32>
    %103 = vector.broadcast %102 : vector<2x1xf32> to vector<2x8xf32>
    %104 = arith.mulf %99, %103 : vector<2x8xf32>
    %105 = vector.shape_cast %104 : vector<2x8xf32> to vector<2x8x1xf32>
    %106 = vector.broadcast %105 : vector<2x8x1xf32> to vector<2x8x32xf32>
    %107 = arith.mulf %106, %1 : vector<2x8x32xf32>
    %cst_39 = arith.constant dense<0.000000e+00> : vector<2x32xf32>
    %108 = vector.multi_reduction <add>, %107, %cst_39 [1] : vector<2x8x32xf32> to vector<2x32xf32>
    %109 = arith.index_cast %c1_i32 : i32 to index
    %c0_40 = arith.constant 0 : index
    %c0_41 = arith.constant 0 : index
    %110 = vector.load %arg0[%109, %c0_40, %c0_41] : memref<4x2x128xf32, #tpu.memory_space<vmem>>, vector<1x2x128xf32>
    %111 = vector.shape_cast %110 : vector<1x2x128xf32> to vector<2x128xf32>
    %cst_42 = arith.constant dense<0.000000e+00> : vector<2x128xf32>
    %112 = tpu.matmul %108, %3, %cst_42 {dimension_numbers = #tpu.dot_dimension_numbers<[1], [0], [0], [1], [0, 0, 1, 1], [], []>} : vector<2x32xf32>, vector<32x128xf32>, vector<2x128xf32> -> vector<2x128xf32>
    %113 = arith.addf %111, %112 : vector<2x128xf32>
    %114 = arith.addf %113, %86 : vector<2x128xf32>
    %115 = vector.extract_strided_slice %114 {offsets = [0, 0], sizes = [2, 32], strides = [1, 1]} : vector<2x128xf32> to vector<2x32xf32>
    %116 = arith.negf %115 : vector<2x32xf32>
    %117 = math.exp %116 : vector<2x32xf32>
    %cst_43 = arith.constant 1.000000e+00 : f32
    %118 = vector.broadcast %cst_43 : f32 to vector<2x32xf32>
    %119 = arith.addf %118, %117 : vector<2x32xf32>
    %120 = arith.divf %118, %119 : vector<2x32xf32>
    %121 = vector.extract_strided_slice %114 {offsets = [0, 32], sizes = [2, 32], strides = [1, 1]} : vector<2x128xf32> to vector<2x32xf32>
    %122 = arith.negf %121 : vector<2x32xf32>
    %123 = math.exp %122 : vector<2x32xf32>
    %cst_44 = arith.constant 1.000000e+00 : f32
    %124 = vector.broadcast %cst_44 : f32 to vector<2x32xf32>
    %125 = arith.addf %124, %123 : vector<2x32xf32>
    %126 = arith.divf %124, %125 : vector<2x32xf32>
    %127 = vector.extract_strided_slice %114 {offsets = [0, 64], sizes = [2, 32], strides = [1, 1]} : vector<2x128xf32> to vector<2x32xf32>
    %128 = math.tanh %127 : vector<2x32xf32>
    %129 = vector.extract_strided_slice %114 {offsets = [0, 96], sizes = [2, 32], strides = [1, 1]} : vector<2x128xf32> to vector<2x32xf32>
    %130 = arith.negf %129 : vector<2x32xf32>
    %131 = math.exp %130 : vector<2x32xf32>
    %cst_45 = arith.constant 1.000000e+00 : f32
    %132 = vector.broadcast %cst_45 : f32 to vector<2x32xf32>
    %133 = arith.addf %132, %131 : vector<2x32xf32>
    %134 = arith.divf %132, %133 : vector<2x32xf32>
    %135 = arith.mulf %126, %62 : vector<2x32xf32>
    %136 = arith.mulf %120, %128 : vector<2x32xf32>
    %137 = arith.addf %135, %136 : vector<2x32xf32>
    %138 = math.tanh %137 : vector<2x32xf32>
    %139 = arith.mulf %134, %138 : vector<2x32xf32>
    %cst_46 = arith.constant dense<0.000000e+00> : vector<2x64xf32>
    %140 = tpu.matmul %139, %6, %cst_46 {dimension_numbers = #tpu.dot_dimension_numbers<[1], [0], [0], [1], [0, 0, 1, 1], [], []>} : vector<2x32xf32>, vector<32x64xf32>, vector<2x64xf32> -> vector<2x64xf32>
    %141 = vector.broadcast %7 : vector<1x64xf32> to vector<2x64xf32>
    %142 = arith.addf %140, %141 : vector<2x64xf32>
    %cst_47 = arith.constant dense<0xFF800000> : vector<2xf32>
    %143 = vector.multi_reduction <maximumf>, %142, %cst_47 [1] : vector<2x64xf32> to vector<2xf32>
    %144 = vector.shape_cast %143 : vector<2xf32> to vector<2x1xf32>
    %145 = vector.broadcast %144 : vector<2x1xf32> to vector<2x64xf32>
    %146 = arith.subf %142, %145 : vector<2x64xf32>
    %147 = math.exp %146 : vector<2x64xf32>
    %cst_48 = arith.constant dense<0.000000e+00> : vector<2xf32>
    %148 = vector.multi_reduction <add>, %147, %cst_48 [1] : vector<2x64xf32> to vector<2xf32>
    %149 = vector.shape_cast %148 : vector<2xf32> to vector<2x1xf32>
    %150 = vector.broadcast %149 : vector<2x1xf32> to vector<2x64xf32>
    %151 = arith.divf %147, %150 : vector<2x64xf32>
    %152 = arith.index_cast %c1_i32 : i32 to index
    %c0_49 = arith.constant 0 : index
    %c0_50 = arith.constant 0 : index
    %153 = vector.load %arg9[%152, %c0_49, %c0_50] : memref<4x2x64xf32, #tpu.memory_space<vmem>>, vector<1x2x64xf32>
    %154 = vector.shape_cast %153 : vector<1x2x64xf32> to vector<2x64xf32>
    %155 = vector.shape_cast %151 : vector<2x64xf32> to vector<1x2x64xf32>
    tpu.vector_store %arg9[%152, %c0_49, %c0_50], %155 {strides = array<i32>} : memref<4x2x64xf32, #tpu.memory_space<vmem>>, vector<1x2x64xf32>,
    %156 = arith.index_cast %c1_i32 : i32 to index
    %c0_51 = arith.constant 0 : index
    %c0_52 = arith.constant 0 : index
    %157 = vector.load %arg10[%156, %c0_51, %c0_52] : memref<4x2x8xf32, #tpu.memory_space<vmem>>, vector<1x2x8xf32>
    %158 = vector.shape_cast %157 : vector<1x2x8xf32> to vector<2x8xf32>
    %159 = vector.shape_cast %104 : vector<2x8xf32> to vector<1x2x8xf32>
    tpu.vector_store %arg10[%156, %c0_51, %c0_52], %159 {strides = array<i32>} : memref<4x2x8xf32, #tpu.memory_space<vmem>>, vector<1x2x8xf32>,
    %c2_i32 = arith.constant 2 : i32
    %cst_53 = arith.constant dense<0.000000e+00> : vector<2x144xf32>
    %160 = tpu.matmul %139, %2, %cst_53 {dimension_numbers = #tpu.dot_dimension_numbers<[1], [0], [0], [1], [0, 0, 1, 1], [], []>} : vector<2x32xf32>, vector<32x144xf32>, vector<2x144xf32> -> vector<2x144xf32>
    %161 = vector.extract_strided_slice %160 {offsets = [0, 0], sizes = [2, 128], strides = [1, 1]} : vector<2x144xf32> to vector<2x128xf32>
    %162 = vector.extract_strided_slice %160 {offsets = [0, 128], sizes = [2, 16], strides = [1, 1]} : vector<2x144xf32> to vector<2x16xf32>
    %163 = vector.shape_cast %162 : vector<2x16xf32> to vector<2x1x16xf32>
    %164 = vector.broadcast %163 : vector<2x1x16xf32> to vector<2x8x16xf32>
    %165 = arith.addf %164, %0 : vector<2x8x16xf32>
    %166 = math.tanh %165 : vector<2x8x16xf32>
    %167 = vector.broadcast %5 : vector<1x1x16xf32> to vector<2x8x16xf32>
    %168 = arith.mulf %166, %167 : vector<2x8x16xf32>
    %cst_54 = arith.constant dense<0.000000e+00> : vector<2x8xf32>
    %169 = vector.multi_reduction <add>, %168, %cst_54 [2] : vector<2x8x16xf32> to vector<2x8xf32>
    %cst_55 = arith.constant dense<0xFF800000> : vector<2xf32>
    %170 = vector.multi_reduction <maximumf>, %169, %cst_55 [1] : vector<2x8xf32> to vector<2xf32>
    %171 = vector.shape_cast %170 : vector<2xf32> to vector<2x1xf32>
    %172 = vector.broadcast %171 : vector<2x1xf32> to vector<2x8xf32>
    %173 = arith.subf %169, %172 : vector<2x8xf32>
    %174 = math.exp %173 : vector<2x8xf32>
    %cst_56 = arith.constant dense<0.000000e+00> : vector<2xf32>
    %175 = vector.multi_reduction <add>, %174, %cst_56 [1] : vector<2x8xf32> to vector<2xf32>
    %176 = vector.shape_cast %175 : vector<2xf32> to vector<2x1xf32>
    %177 = tpu.reciprocal %176 {approx = true} : vector<2x1xf32> -> vector<2x1xf32>
    %178 = vector.broadcast %177 : vector<2x1xf32> to vector<2x8xf32>
    %179 = arith.mulf %174, %178 : vector<2x8xf32>
    %180 = vector.shape_cast %179 : vector<2x8xf32> to vector<2x8x1xf32>
    %181 = vector.broadcast %180 : vector<2x8x1xf32> to vector<2x8x32xf32>
    %182 = arith.mulf %181, %1 : vector<2x8x32xf32>
    %cst_57 = arith.constant dense<0.000000e+00> : vector<2x32xf32>
    %183 = vector.multi_reduction <add>, %182, %cst_57 [1] : vector<2x8x32xf32> to vector<2x32xf32>
    %184 = arith.index_cast %c2_i32 : i32 to index
    %c0_58 = arith.constant 0 : index
    %c0_59 = arith.constant 0 : index
    %185 = vector.load %arg0[%184, %c0_58, %c0_59] : memref<4x2x128xf32, #tpu.memory_space<vmem>>, vector<1x2x128xf32>
    %186 = vector.shape_cast %185 : vector<1x2x128xf32> to vector<2x128xf32>
    %cst_60 = arith.constant dense<0.000000e+00> : vector<2x128xf32>
    %187 = tpu.matmul %183, %3, %cst_60 {dimension_numbers = #tpu.dot_dimension_numbers<[1], [0], [0], [1], [0, 0, 1, 1], [], []>} : vector<2x32xf32>, vector<32x128xf32>, vector<2x128xf32> -> vector<2x128xf32>
    %188 = arith.addf %186, %187 : vector<2x128xf32>
    %189 = arith.addf %188, %161 : vector<2x128xf32>
    %190 = vector.extract_strided_slice %189 {offsets = [0, 0], sizes = [2, 32], strides = [1, 1]} : vector<2x128xf32> to vector<2x32xf32>
    %191 = arith.negf %190 : vector<2x32xf32>
    %192 = math.exp %191 : vector<2x32xf32>
    %cst_61 = arith.constant 1.000000e+00 : f32
    %193 = vector.broadcast %cst_61 : f32 to vector<2x32xf32>
    %194 = arith.addf %193, %192 : vector<2x32xf32>
    %195 = arith.divf %193, %194 : vector<2x32xf32>
    %196 = vector.extract_strided_slice %189 {offsets = [0, 32], sizes = [2, 32], strides = [1, 1]} : vector<2x128xf32> to vector<2x32xf32>
    %197 = arith.negf %196 : vector<2x32xf32>
    %198 = math.exp %197 : vector<2x32xf32>
    %cst_62 = arith.constant 1.000000e+00 : f32
    %199 = vector.broadcast %cst_62 : f32 to vector<2x32xf32>
    %200 = arith.addf %199, %198 : vector<2x32xf32>
    %201 = arith.divf %199, %200 : vector<2x32xf32>
    %202 = vector.extract_strided_slice %189 {offsets = [0, 64], sizes = [2, 32], strides = [1, 1]} : vector<2x128xf32> to vector<2x32xf32>
    %203 = math.tanh %202 : vector<2x32xf32>
    %204 = vector.extract_strided_slice %189 {offsets = [0, 96], sizes = [2, 32], strides = [1, 1]} : vector<2x128xf32> to vector<2x32xf32>
    %205 = arith.negf %204 : vector<2x32xf32>
    %206 = math.exp %205 : vector<2x32xf32>
    %cst_63 = arith.constant 1.000000e+00 : f32
    %207 = vector.broadcast %cst_63 : f32 to vector<2x32xf32>
    %208 = arith.addf %207, %206 : vector<2x32xf32>
    %209 = arith.divf %207, %208 : vector<2x32xf32>
    %210 = arith.mulf %201, %137 : vector<2x32xf32>
    %211 = arith.mulf %195, %203 : vector<2x32xf32>
    %212 = arith.addf %210, %211 : vector<2x32xf32>
    %213 = math.tanh %212 : vector<2x32xf32>
    %214 = arith.mulf %209, %213 : vector<2x32xf32>
    %cst_64 = arith.constant dense<0.000000e+00> : vector<2x64xf32>
    %215 = tpu.matmul %214, %6, %cst_64 {dimension_numbers = #tpu.dot_dimension_numbers<[1], [0], [0], [1], [0, 0, 1, 1], [], []>} : vector<2x32xf32>, vector<32x64xf32>, vector<2x64xf32> -> vector<2x64xf32>
    %216 = vector.broadcast %7 : vector<1x64xf32> to vector<2x64xf32>
    %217 = arith.addf %215, %216 : vector<2x64xf32>
    %cst_65 = arith.constant dense<0xFF800000> : vector<2xf32>
    %218 = vector.multi_reduction <maximumf>, %217, %cst_65 [1] : vector<2x64xf32> to vector<2xf32>
    %219 = vector.shape_cast %218 : vector<2xf32> to vector<2x1xf32>
    %220 = vector.broadcast %219 : vector<2x1xf32> to vector<2x64xf32>
    %221 = arith.subf %217, %220 : vector<2x64xf32>
    %222 = math.exp %221 : vector<2x64xf32>
    %cst_66 = arith.constant dense<0.000000e+00> : vector<2xf32>
    %223 = vector.multi_reduction <add>, %222, %cst_66 [1] : vector<2x64xf32> to vector<2xf32>
    %224 = vector.shape_cast %223 : vector<2xf32> to vector<2x1xf32>
    %225 = vector.broadcast %224 : vector<2x1xf32> to vector<2x64xf32>
    %226 = arith.divf %222, %225 : vector<2x64xf32>
    %227 = arith.index_cast %c2_i32 : i32 to index
    %c0_67 = arith.constant 0 : index
    %c0_68 = arith.constant 0 : index
    %228 = vector.load %arg9[%227, %c0_67, %c0_68] : memref<4x2x64xf32, #tpu.memory_space<vmem>>, vector<1x2x64xf32>
    %229 = vector.shape_cast %228 : vector<1x2x64xf32> to vector<2x64xf32>
    %230 = vector.shape_cast %226 : vector<2x64xf32> to vector<1x2x64xf32>
    tpu.vector_store %arg9[%227, %c0_67, %c0_68], %230 {strides = array<i32>} : memref<4x2x64xf32, #tpu.memory_space<vmem>>, vector<1x2x64xf32>,
    %231 = arith.index_cast %c2_i32 : i32 to index
    %c0_69 = arith.constant 0 : index
    %c0_70 = arith.constant 0 : index
    %232 = vector.load %arg10[%231, %c0_69, %c0_70] : memref<4x2x8xf32, #tpu.memory_space<vmem>>, vector<1x2x8xf32>
    %233 = vector.shape_cast %232 : vector<1x2x8xf32> to vector<2x8xf32>
    %234 = vector.shape_cast %179 : vector<2x8xf32> to vector<1x2x8xf32>
    tpu.vector_store %arg10[%231, %c0_69, %c0_70], %234 {strides = array<i32>} : memref<4x2x8xf32, #tpu.memory_space<vmem>>, vector<1x2x8xf32>,
    %c3_i32 = arith.constant 3 : i32
    %cst_71 = arith.constant dense<0.000000e+00> : vector<2x144xf32>
    %235 = tpu.matmul %214, %2, %cst_71 {dimension_numbers = #tpu.dot_dimension_numbers<[1], [0], [0], [1], [0, 0, 1, 1], [], []>} : vector<2x32xf32>, vector<32x144xf32>, vector<2x144xf32> -> vector<2x144xf32>
    %236 = vector.extract_strided_slice %235 {offsets = [0, 0], sizes = [2, 128], strides = [1, 1]} : vector<2x144xf32> to vector<2x128xf32>
    %237 = vector.extract_strided_slice %235 {offsets = [0, 128], sizes = [2, 16], strides = [1, 1]} : vector<2x144xf32> to vector<2x16xf32>
    %238 = vector.shape_cast %237 : vector<2x16xf32> to vector<2x1x16xf32>
    %239 = vector.broadcast %238 : vector<2x1x16xf32> to vector<2x8x16xf32>
    %240 = arith.addf %239, %0 : vector<2x8x16xf32>
    %241 = math.tanh %240 : vector<2x8x16xf32>
    %242 = vector.broadcast %5 : vector<1x1x16xf32> to vector<2x8x16xf32>
    %243 = arith.mulf %241, %242 : vector<2x8x16xf32>
    %cst_72 = arith.constant dense<0.000000e+00> : vector<2x8xf32>
    %244 = vector.multi_reduction <add>, %243, %cst_72 [2] : vector<2x8x16xf32> to vector<2x8xf32>
    %cst_73 = arith.constant dense<0xFF800000> : vector<2xf32>
    %245 = vector.multi_reduction <maximumf>, %244, %cst_73 [1] : vector<2x8xf32> to vector<2xf32>
    %246 = vector.shape_cast %245 : vector<2xf32> to vector<2x1xf32>
    %247 = vector.broadcast %246 : vector<2x1xf32> to vector<2x8xf32>
    %248 = arith.subf %244, %247 : vector<2x8xf32>
    %249 = math.exp %248 : vector<2x8xf32>
    %cst_74 = arith.constant dense<0.000000e+00> : vector<2xf32>
    %250 = vector.multi_reduction <add>, %249, %cst_74 [1] : vector<2x8xf32> to vector<2xf32>
    %251 = vector.shape_cast %250 : vector<2xf32> to vector<2x1xf32>
    %252 = tpu.reciprocal %251 {approx = true} : vector<2x1xf32> -> vector<2x1xf32>
    %253 = vector.broadcast %252 : vector<2x1xf32> to vector<2x8xf32>
    %254 = arith.mulf %249, %253 : vector<2x8xf32>
    %255 = vector.shape_cast %254 : vector<2x8xf32> to vector<2x8x1xf32>
    %256 = vector.broadcast %255 : vector<2x8x1xf32> to vector<2x8x32xf32>
    %257 = arith.mulf %256, %1 : vector<2x8x32xf32>
    %cst_75 = arith.constant dense<0.000000e+00> : vector<2x32xf32>
    %258 = vector.multi_reduction <add>, %257, %cst_75 [1] : vector<2x8x32xf32> to vector<2x32xf32>
    %259 = arith.index_cast %c3_i32 : i32 to index
    %c0_76 = arith.constant 0 : index
    %c0_77 = arith.constant 0 : index
    %260 = vector.load %arg0[%259, %c0_76, %c0_77] : memref<4x2x128xf32, #tpu.memory_space<vmem>>, vector<1x2x128xf32>
    %261 = vector.shape_cast %260 : vector<1x2x128xf32> to vector<2x128xf32>
    %cst_78 = arith.constant dense<0.000000e+00> : vector<2x128xf32>
    %262 = tpu.matmul %258, %3, %cst_78 {dimension_numbers = #tpu.dot_dimension_numbers<[1], [0], [0], [1], [0, 0, 1, 1], [], []>} : vector<2x32xf32>, vector<32x128xf32>, vector<2x128xf32> -> vector<2x128xf32>
    %263 = arith.addf %261, %262 : vector<2x128xf32>
    %264 = arith.addf %263, %236 : vector<2x128xf32>
    %265 = vector.extract_strided_slice %264 {offsets = [0, 0], sizes = [2, 32], strides = [1, 1]} : vector<2x128xf32> to vector<2x32xf32>
    %266 = arith.negf %265 : vector<2x32xf32>
    %267 = math.exp %266 : vector<2x32xf32>
    %cst_79 = arith.constant 1.000000e+00 : f32
    %268 = vector.broadcast %cst_79 : f32 to vector<2x32xf32>
    %269 = arith.addf %268, %267 : vector<2x32xf32>
    %270 = arith.divf %268, %269 : vector<2x32xf32>
    %271 = vector.extract_strided_slice %264 {offsets = [0, 32], sizes = [2, 32], strides = [1, 1]} : vector<2x128xf32> to vector<2x32xf32>
    %272 = arith.negf %271 : vector<2x32xf32>
    %273 = math.exp %272 : vector<2x32xf32>
    %cst_80 = arith.constant 1.000000e+00 : f32
    %274 = vector.broadcast %cst_80 : f32 to vector<2x32xf32>
    %275 = arith.addf %274, %273 : vector<2x32xf32>
    %276 = arith.divf %274, %275 : vector<2x32xf32>
    %277 = vector.extract_strided_slice %264 {offsets = [0, 64], sizes = [2, 32], strides = [1, 1]} : vector<2x128xf32> to vector<2x32xf32>
    %278 = math.tanh %277 : vector<2x32xf32>
    %279 = vector.extract_strided_slice %264 {offsets = [0, 96], sizes = [2, 32], strides = [1, 1]} : vector<2x128xf32> to vector<2x32xf32>
    %280 = arith.negf %279 : vector<2x32xf32>
    %281 = math.exp %280 : vector<2x32xf32>
    %cst_81 = arith.constant 1.000000e+00 : f32
    %282 = vector.broadcast %cst_81 : f32 to vector<2x32xf32>
    %283 = arith.addf %282, %281 : vector<2x32xf32>
    %284 = arith.divf %282, %283 : vector<2x32xf32>
    %285 = arith.mulf %276, %212 : vector<2x32xf32>
    %286 = arith.mulf %270, %278 : vector<2x32xf32>
    %287 = arith.addf %285, %286 : vector<2x32xf32>
    %288 = math.tanh %287 : vector<2x32xf32>
    %289 = arith.mulf %284, %288 : vector<2x32xf32>
    %cst_82 = arith.constant dense<0.000000e+00> : vector<2x64xf32>
    %290 = tpu.matmul %289, %6, %cst_82 {dimension_numbers = #tpu.dot_dimension_numbers<[1], [0], [0], [1], [0, 0, 1, 1], [], []>} : vector<2x32xf32>, vector<32x64xf32>, vector<2x64xf32> -> vector<2x64xf32>
    %291 = vector.broadcast %7 : vector<1x64xf32> to vector<2x64xf32>
    %292 = arith.addf %290, %291 : vector<2x64xf32>
    %cst_83 = arith.constant dense<0xFF800000> : vector<2xf32>
    %293 = vector.multi_reduction <maximumf>, %292, %cst_83 [1] : vector<2x64xf32> to vector<2xf32>
    %294 = vector.shape_cast %293 : vector<2xf32> to vector<2x1xf32>
    %295 = vector.broadcast %294 : vector<2x1xf32> to vector<2x64xf32>
    %296 = arith.subf %292, %295 : vector<2x64xf32>
    %297 = math.exp %296 : vector<2x64xf32>
    %cst_84 = arith.constant dense<0.000000e+00> : vector<2xf32>
    %298 = vector.multi_reduction <add>, %297, %cst_84 [1] : vector<2x64xf32> to vector<2xf32>
    %299 = vector.shape_cast %298 : vector<2xf32> to vector<2x1xf32>
    %300 = vector.broadcast %299 : vector<2x1xf32> to vector<2x64xf32>
    %301 = arith.divf %297, %300 : vector<2x64xf32>
    %302 = arith.index_cast %c3_i32 : i32 to index
    %c0_85 = arith.constant 0 : index
    %c0_86 = arith.constant 0 : index
    %303 = vector.load %arg9[%302, %c0_85, %c0_86] : memref<4x2x64xf32, #tpu.memory_space<vmem>>, vector<1x2x64xf32>
    %304 = vector.shape_cast %303 : vector<1x2x64xf32> to vector<2x64xf32>
    %305 = vector.shape_cast %301 : vector<2x64xf32> to vector<1x2x64xf32>
    tpu.vector_store %arg9[%302, %c0_85, %c0_86], %305 {strides = array<i32>} : memref<4x2x64xf32, #tpu.memory_space<vmem>>, vector<1x2x64xf32>,
    %306 = arith.index_cast %c3_i32 : i32 to index
    %c0_87 = arith.constant 0 : index
    %c0_88 = arith.constant 0 : index
    %307 = vector.load %arg10[%306, %c0_87, %c0_88] : memref<4x2x8xf32, #tpu.memory_space<vmem>>, vector<1x2x8xf32>
    %308 = vector.shape_cast %307 : vector<1x2x8xf32> to vector<2x8xf32>
    %309 = vector.shape_cast %254 : vector<2x8xf32> to vector<1x2x8xf32>
    tpu.vector_store %arg10[%306, %c0_87, %c0_88], %309 {strides = array<i32>} : memref<4x2x8xf32, #tpu.memory_space<vmem>>, vector<1x2x8xf32>,
    %c4_i32 = arith.constant 4 : i32
    %c0_89 = arith.constant 0 : index
    %c0_90 = arith.constant 0 : index
    %c0_91 = arith.constant 0 : index
    %310 = vector.load %arg11[%c0_89, %c0_90, %c0_91] : memref<2x2x32xf32, #tpu.memory_space<vmem>>, vector<1x2x32xf32>
    %311 = vector.shape_cast %310 : vector<1x2x32xf32> to vector<2x32xf32>
    %312 = vector.shape_cast %289 : vector<2x32xf32> to vector<1x2x32xf32>
    tpu.vector_store %arg11[%c0_89, %c0_90, %c0_91], %312 {strides = array<i32>} : memref<2x2x32xf32, #tpu.memory_space<vmem>>, vector<1x2x32xf32>,
    %c1 = arith.constant 1 : index
    %c0_92 = arith.constant 0 : index
    %c0_93 = arith.constant 0 : index
    %313 = vector.load %arg11[%c1, %c0_92, %c0_93] : memref<2x2x32xf32, #tpu.memory_space<vmem>>, vector<1x2x32xf32>
    %314 = vector.shape_cast %313 : vector<1x2x32xf32> to vector<2x32xf32>
    %315 = vector.shape_cast %287 : vector<2x32xf32> to vector<1x2x32xf32>
    tpu.vector_store %arg11[%c1, %c0_92, %c0_93], %315 {strides = array<i32>} : memref<2x2x32xf32, #tpu.memory_space<vmem>>, vector<1x2x32xf32>,
    return
  }
}

</mosaic_0001>

<bundles_post_ra>
// kernel: tpu_custom_call.1
= control target key start
LH: loop header
LB: loop body
LE: loop exit
PB: predicated region body
PF: predicated region fallthrough
CT: control target
= control target key end

     0   :  { %17 = vsyncpa [#allocation3], 0  ;;  %s2088_s0 = inlined_call_operand.hbm [shape: f32[4,2,128], index: 0, kind: input, shape index: {}]   ;;  %s2089_s1 = inlined_call_operand.hbm [shape: f32[2,32], index: 1, kind: input, shape index: {}]   ;;  %s2090_s2 = inlined_call_operand.hbm [shape: f32[2,32], index: 2, kind: input, shape index: {}]   ;;  %s2091_s3 = inlined_call_operand.hbm [shape: f32[2,8,16], index: 3, kind: input, shape index: {}]   ;;  %s2092_s4 = inlined_call_operand.hbm [shape: f32[2,8,32], index: 4, kind: input, shape index: {}]   ;;  %s2093_s5 = inlined_call_operand.hbm [shape: f32[32,144], index: 5, kind: input, shape index: {}]   ;;  %s2094_s6 = inlined_call_operand.hbm [shape: f32[32,128], index: 6, kind: input, shape index: {}]   ;;  %s2095_s7 = inlined_call_operand.vmem [shape: f32[1,16], index: 7, kind: input, shape index: {}]   ;;  %s2096_s8 = inlined_call_operand.hbm [shape: f32[33,64], index: 8, kind: input, shape index: {}]   ;;  %s2097_s9 = inlined_call_operand.hbm [shape: f32[4,2,64], index: 9, kind: output, shape index: {0}]   ;;  %s2098_s10 = inlined_call_operand.hbm [shape: f32[4,2,8], index: 10, kind: output, shape index: {1}]   ;;  %s2099_s11 = inlined_call_operand.hbm [shape: f32[2,2,32], index: 11, kind: output, shape index: {2}]  }
   0x1   :  { %18 = vsyncpa [#allocation6], 0 }
   0x2   :  { %19 = vsyncpa [#allocation9], 0 }
   0x3   :  { %20 = vsyncpa [#allocation12], 0 }
   0x4   :  { %21 = vsyncpa [#allocation15], 0 }
   0x5   :  { %22 = vsyncpa [#allocation4], 0  ;;  %s42_s19 = sshll.u32 %s2089_s1, 4  ;;  %s43_s19 = int_to_ptr.hbm [resolvable:$true] %s42_s19 }
   0x6   :  { %23 = vsyncpa [#allocation18], 0  ;;  %s1675_s20 = smov [#allocation5]   ;;  %s63_s24 = sshll.u32 %s2091_s3, 4  ;;  %s64_s24 = int_to_ptr.hbm [resolvable:$true] %s63_s24 }
   0x7   :  { %s44_s21 = sshll.u32 %s1675_s20, 4  ;;  %s1676_s25 = smov [#allocation8]   ;;  %s45_s21 = int_to_ptr.vmem [resolvable:$true] %s44_s21 }
   0x8   :  { %47 = dma.hbm_to_vmem [thread:$0]  %s43_s19, 32, %s45_s21, [#allocation6]  }
   0x9   :  { %s65_s26 = sshll.u32 %s1676_s25, 4  ;;  %s1677_s27 = smov 128   ;;  %s66_s26 = int_to_ptr.vmem [resolvable:$true] %s65_s26 }
   0xa   :  { %s1678_s28 = smov 8   ;;  %s89_s30 = sshll.u32 %s2093_s5, 4  ;;  %s90_s30 = int_to_ptr.hbm [resolvable:$true] %s89_s30 }
   0xb   :  { %71 = dma.hbm_to_vmem [thread:$0]  %s64_s24, 256, %s66_s26, [#allocation9], %s1677_s27, %s1677_s27, %s1678_s28  }
   0xc   :  { %s1679_s12 = smov [#allocation11]   ;;  %s28_s15 = sshll.u32 %s2088_s0, 4  ;;  %s29_s15 = int_to_ptr.hbm [resolvable:$true] %s28_s15 }
   0xd   :  { %s91_s13 = sshll.u32 %s1679_s12, 4  ;;  %s1680_s16 = smov 256   ;;  %s92_s13 = int_to_ptr.vmem [resolvable:$true] %s91_s13 }
   0xe   :  { %s1681_s17 = smov 16   ;;  %s1682_s18 = smov [#allocation2]  }
   0xf   :  { %97 = dma.hbm_to_vmem [thread:$0]  %s90_s30, 1024, %s92_s13, [#allocation12], %s1680_s16, %s1680_s16, %s1681_s17  }
  0x10   :  { %s30_s19 = sshll.u32 %s1682_s18, 4  ;;  %s1683_s20 = smov 32   ;;  %s31_s19 = int_to_ptr.vmem [resolvable:$true] %s30_s19 }
  0x11   :  { %s1684_s21 = smov 2   ;;  %s53_s23 = sshll.u32 %s2090_s2, 4  ;;  %s54_s23 = int_to_ptr.hbm [resolvable:$true] %s53_s23 }
  0x12   :  { %36 = dma.hbm_to_vmem [thread:$0]  %s29_s15, 128, %s31_s19, [#allocation3], %s1683_s20, %s1683_s20, %s1684_s21  }
  0x13   :  { %s1685_s24 = smov [#allocation7]   ;;  %s76_s1 = sshll.u32 %s2092_s4, 4  ;;  %s77_s1 = int_to_ptr.hbm [resolvable:$true] %s76_s1 }
  0x14   :  { %s55_s0 = sshll.u32 %s1685_s24, 4  ;;  %s1686_s29 = smov [#allocation10]   ;;  %s56_s0 = int_to_ptr.vmem [resolvable:$true] %s55_s0 }
  0x15   :  { %58 = dma.hbm_to_vmem [thread:$0]  %s54_s23, 32, %s56_s0, [#allocation6]  }
  0x16   :  { %s78_s30 = sshll.u32 %s1686_s29, 4  ;;  %s102_s3 = sshll.u32 %s2094_s6, 4  ;;  %s79_s30 = int_to_ptr.vmem [resolvable:$true] %s78_s30  ;;  %s103_s3 = int_to_ptr.hbm [resolvable:$true] %s102_s3 }
  0x17   :  { %84 = dma.hbm_to_vmem [thread:$0]  %s77_s1, 256, %s79_s30, [#allocation9], %s1677_s27, %s1677_s27, %s1678_s28  }
  0x18   :  { %s117_s15 = sshll.u32 %s2096_s8, 4  ;;  %s1687_s16 = smov [#allocation13]   ;;  %s118_s15 = int_to_ptr.hbm [resolvable:$true] %s117_s15 }
  0x19   :  { %s104_s4 = sshll.u32 %s1687_s16, 4  ;;  %s1688_s17 = smov [#allocation14]   ;;  %s105_s4 = int_to_ptr.vmem [resolvable:$true] %s104_s4 }
  0x1a   :  { %110 = dma.hbm_to_vmem [thread:$0]  %s103_s3, 512, %s105_s4, [#allocation12], %s1677_s27, %s1677_s27, %s1678_s28  }
  0x1b   :  { %s119_s6 = sshll.u32 %s1688_s17, 4  ;;  %s120_s6 = int_to_ptr.vmem [resolvable:$true] %s119_s6 }
  0x1c   :  { %125 = dma.hbm_to_vmem [thread:$0]  %s118_s15, 640, %s120_s6, [#allocation15], %s1677_s27, %s1677_s27, %s1678_s28  }
  0x1d   :  { %1661 = dma.done.wait [#allocation3], 128  }
  0x1e   :  { %1662 = vsyncadd [#allocation3], 4294967168 }
  0x1f   :  { %1663 = dma.done.wait [#allocation6], 64  }
  0x20   :  { %1664 = vsyncadd [#allocation6], 4294967232 }
  0x21   :  { %1665 = dma.done.wait [#allocation9], 512  }
  0x22   :  { %1666 = vsyncadd [#allocation9], 4294966784 }
  0x23   :  { %1667 = dma.done.wait [#allocation12], 1536  }
  0x24   :  { %1668 = vsyncadd [#allocation12], 4294965760 }
  0x25   :  { %1669 = dma.done.wait [#allocation15], 640  }
  0x26   :  { %1670 = vsyncadd [#allocation15], 4294966656  ;;  %v1794_v0 = vld [vmem:[#allocation11 + $0x38] sm:$0xff]  ;;  %v1796_v1 = vld [vmem:[#allocation11 + $0x28] sm:$0xff]  ;;  %vm182_vm0 = vcmask 261120   ;;  %vm241_vm1 = vcmask 130048   ;;  %v250_v21 = vlaneseq }
  0x27   :  { %218 = vmatpush.msra.mxu1 %v1794_v0  ;;  %v1799_v2 = vld [vmem:[#allocation11 + $0x18] sm:$0xff]  ;;  %v1802_v3 = vld [vmem:[#allocation11 + $0x8] sm:$0xff]  ;;  %v1818_v5 = vld [vmem:[#allocation8] sm:$0xff]  ;;  %vm254_vm2 = vcmask 1041409   ;;  %vm257_vm3 = vcmask 58368   ;;  %v1689_v28 = vmov 0  }
  0x28   :  { %v1805_v4 = vld [vmem:[#allocation5] sm:$0x3]  ;;  %v1820_v9 = vld [vmem:[#allocation8 + $0x8] sm:$0xff]  ;;  %v1827_v13 = vld [vmem:[%s2095_s7] ss:$0 sm:$0xff]  ;;  %v1833_v22 = vand.u32 127, %v250_v21  ;;  %1305 = vset.pattern.permute.xlu2 %v1689_v28  ;;  %1304 = vset.pattern.permute.xlu1 %v1689_v28 }
  0x29   :  { %219 = vmatpush.msra.mxu1 %v1796_v1  ;;  %1306 = vset.pattern.permute.xlu0 %v1689_v28  ;;  %v1843_v50 = vld [vmem:[#allocation13 + $0x18] sm:$0xff]  ;;  %v1845_v51 = vld [vmem:[#allocation13 + $0x10] sm:$0xff]  ;;  %v1848_v52 = vld [vmem:[#allocation13 + $0x8] sm:$0xff]  ;;  %s1690_s7 = smov 64   ;;  %s1691_s28 = smov 96  }
  0x2a   :  { %339 = vmatpush.msra.mxu2 %v1843_v50  ;;  %v1851_v53 = vld [vmem:[#allocation13] sm:$0xff]  ;;  %v1855_v54 = vld [vmem:[#allocation11 + $0x30] sm:$0xff]  ;;  %v1875_v58 = vld [vmem:[#allocation10 + $0x8] sm:$0xff]  ;;  %s1692_s18 = smov [#allocation17]   ;;  %s1225_s23 = sshll.u32 %s2098_s10, 4  ;;  %s1226_s23 = int_to_ptr.hbm [resolvable:$true] %s1225_s23 }
  0x2b   :  { %220 = vmatpush.msra.mxu1 %v1799_v2  ;;  %v1857_v55 = vld [vmem:[#allocation11 + $0x20] sm:$0xff]  ;;  %198 = vmatpush.msra.mxu0 %v1855_v54  ;;  %v1861_v56 = vld [vmem:[#allocation11 + $0x10] sm:$0xff]  ;;  %s1223_s19 = sshll.u32 %s1692_s18, 4  ;;  %s1693_s24 = smov [#allocation19]   ;;  %s1224_s19 = int_to_ptr.vmem [resolvable:$true] %s1223_s19 }
  0x2c   :  { %340 = vmatpush.msra.mxu2 %v1845_v51  ;;  %v1865_v57 = vld [vmem:[#allocation11] sm:$0xff]  ;;  %v1877_v59 = vld [vmem:[#allocation10] sm:$0xff]  ;;  %s1236_s0 = sshll.u32 %s1693_s24, 4  ;;  %s1238_s26 = sshll.u32 %s2099_s11, 4  ;;  %s1237_s0 = int_to_ptr.vmem [resolvable:$true] %s1236_s0  ;;  %s1239_s26 = int_to_ptr.hbm [resolvable:$true] %s1238_s26 }
  0x2d   :  { %221 = vmatpush.msra.mxu1 %v1802_v3  ;;  %199 = vmatpush.msra.mxu0 %v1857_v55  ;;  %s1694_s11 = smov [#allocation16]   ;;  %s1212_s12 = sshll.u32 %s2097_s9, 4  ;;  %s1213_s12 = int_to_ptr.hbm [resolvable:$true] %s1212_s12 }
  0x2e   :  { %1265 = vmatmul.msk.f32.vlgmr.msra.gmra.mxu1 %vm182_vm0, %v1805_v4  ;;  %341 = vmatpush.msra.mxu2 %v1848_v52  ;;  %s1210_s1 = sshll.u32 %s1694_s11, 4  ;;  %s1211_s1 = int_to_ptr.vmem [resolvable:$true] %s1210_s1 }
  0x2f   :  { %479 = vmatpush.msrb.mxu1 %v1794_v0  ;;  %200 = vmatpush.msra.mxu0 %v1861_v56 }
  0x30   :  { %342 = vmatpush.msra.mxu2 %v1851_v53 }
  0x31   :  { %480 = vmatpush.msrb.mxu1 %v1796_v1  ;;  %201 = vmatpush.msra.mxu0 %v1865_v57 }
  0x32   :  { %593 = vmatpush.msrb.mxu2 %v1843_v50  ;;  %1264 = vmatmul.msk.f32.vlgmr.msra.gmra.mxu0 %vm182_vm0, %v1805_v4 }
  0x33   :  { %481 = vmatpush.msrb.mxu1 %v1799_v2  ;;  %459 = vmatpush.msrb.mxu0 %v1855_v54 }
  0x34   :  { %594 = vmatpush.msrb.mxu2 %v1845_v51 }
  0x35   :  { %482 = vmatpush.msrb.mxu1 %v1802_v3  ;;  %460 = vmatpush.msrb.mxu0 %v1857_v55 }
  0x36   :  { %595 = vmatpush.msrb.mxu2 %v1848_v52 }
  0x37   :  { %729 = vmatpush.msra.mxu1 %v1794_v0  ;;  %461 = vmatpush.msrb.mxu0 %v1861_v56 }
  0x38   :  { %596 = vmatpush.msrb.mxu2 %v1851_v53 }
  0x39   :  { %730 = vmatpush.msra.mxu1 %v1796_v1  ;;  %462 = vmatpush.msrb.mxu0 %v1865_v57 }
  0x3b   :  { %731 = vmatpush.msra.mxu1 %v1799_v2  ;;  %709 = vmatpush.msra.mxu0 %v1855_v54 }
  0x3d   :  { %732 = vmatpush.msra.mxu1 %v1802_v3  ;;  %710 = vmatpush.msra.mxu0 %v1857_v55 }
  0x3f   :  { %711 = vmatpush.msra.mxu0 %v1861_v56 }
  0x41   :  { %712 = vmatpush.msra.mxu0 %v1865_v57 }
  0xab   :  { %v223_v6 = vpop.f32.mrf.mxu1 }
  0xac   :  { %v227_v7 = vrot.slane %v223_v6, 1  ;;  %v228_v8 = vperm.slane %v223_v6, 0 }
  0xae   :  { %v229_v10 = vperm.slane %v227_v7, 0  ;;  %v232_v11 = vadd.f32 %v228_v8, %v1818_v5 }
  0xaf   :  { %v203_v28 = vpop.f32.mrf.mxu0 }
  0xb0   :  { %v233_v12 = vadd.f32 %v229_v10, %v1820_v9  ;;  %1309 = vtanh.f32 %v232_v11 }
  0xb2   :  { %1311 = vtanh.f32 %v233_v12 }
  0xb6   :  { %v1310_v14 = vpop.eup %1309 }
  0xb7   :  { %v239_v15 = vmul.f32 %v1310_v14, %v1827_v13 }
  0xb8   :  { %v1312_v17 = vpop.eup %1311 }
  0xb9   :  { %v242_v16 = vsel %vm241_vm1, %v239_v15, 0.0  ;;  %v240_v18 = vmul.f32 %v1312_v17, %v1827_v13 }
  0xba   :  { %243 = vadd.xlane.f32.xlu0 %v242_v16 }
  0xbb   :  { %v245_v19 = vsel %vm241_vm1, %v240_v18, 0.0 }
  0xc2   :  { %246 = vadd.xlane.f32.xlu0 %v245_v19 }
 0x12d   :  { %v244_v20 = vpop.xlane.xlu0 %243 }
 0x12e   :  { %v252_v24 = vperm.slane %v244_v20, %v1833_v22 }
 0x135   :  { %v247_v23 = vpop.xlane.xlu0 %246 }
 0x136   :  { %v253_v25 = vperm.slane %v247_v23, %v1833_v22 }
 0x138   :  { %v255_v26 = vsel %vm254_vm2, %v253_v25, %v252_v24 }
 0x139   :  { %v258_v27 = vsel %vm257_vm3, %v255_v26, -inf  ;;  %v321_v26 = vld [vmem:[#allocation2] sm:$0x3] }
 0x13a   :  { %259 = vmax.xlane.f32.xlu1 %v258_v27 }
 0x1ad   :  { %v260_v29 = vpop.xlane.xlu1 %259 }
 0x1ae   :  { %v262_v30 = vperm.slane %v260_v29, 0  ;;  %v263_v31 = vperm.slane %v260_v29, 1 }
 0x1b0   :  { %v266_v32 = vsub.f32 %v244_v20, %v262_v30  ;;  %v267_v33 = vsub.f32 %v247_v23, %v263_v31 }
 0x1b2   :  { %v268_v34 = vmul.f32 1.442695, %v266_v32  ;;  %v270_v35 = vmul.f32 1.442695, %v267_v33  ;;  %v181_v32 = vld [vmem:[#allocation7] sm:$0x3] }
 0x1b4   :  { %1313 = vpow2.f32 %v268_v34 }
 0x1b5   :  { %1315 = vpow2.f32 %v270_v35 }
 0x1ba   :  { %v1314_v36 = vpop.eup %1313 }
 0x1bb   :  { %v1316_v37 = vpop.eup %1315  ;;  %275 = vperm.xlu1 %1304, %v1314_v36  }
 0x1bc   :  { %278 = vperm.xlu2 %1305, %v1316_v37  }
 0x216   :  { %v279_v38 = vpop.permute.xlu2 %278 }
 0x217   :  { %v281_v40 = vperm.slane %v279_v38, %v1833_v22 }
 0x22d   :  { %v276_v39 = vpop.permute.xlu1 %275 }
 0x22e   :  { %v280_v41 = vperm.slane %v276_v39, %v1833_v22 }
 0x230   :  { %v282_v42 = vsel %vm254_vm2, %v281_v40, %v280_v41 }
 0x231   :  { %v284_v43 = vsel %vm257_vm3, %v282_v42, 0.0 }
 0x232   :  { %285 = vadd.xlane.f32.xlu2 %v284_v43 }
 0x2a5   :  { %v286_v44 = vpop.xlane.xlu2 %285 }
 0x2a6   :  { %1317 = vrcp.f32 %v286_v44 }
 0x2ac   :  { %v1318_v45 = vpop.eup %1317 }
 0x2ad   :  { %v290_v46 = vperm.slane %v1318_v45, 1  ;;  %v289_v47 = vperm.slane %v1318_v45, 0 }
 0x2af   :  { %v294_v48 = vmul.f32 %v1316_v37, %v290_v46  ;;  %v293_v49 = vmul.f32 %v1314_v36, %v289_v47 }
 0x2b1   :  { %302 = vperm.xlu1 %1304, %v294_v48   ;;  %297 = vperm.xlu0 %1306, %v293_v49  }
 0x323   :  { %v303_v60 = vpop.permute.xlu1 %302  ;;  %v298_v61 = vpop.permute.xlu0 %297 }
 0x324   :  { %v306_v62 = vmul.f32 %v303_v60, %v1875_v58  ;;  %v443_v63 = vperm.slane %v303_v60, %v1833_v22  ;;  %v305_v4 = vmul.f32 %v298_v61, %v1877_v59  ;;  %v442_v6 = vperm.slane %v298_v61, %v1833_v22 }
 0x326   :  { %v314_v7 = vsel %vm182_vm0, %v306_v62, 0.0  ;;  %v307_v8 = vsel %vm182_vm0, %v305_v4, 0.0  ;;  %v444_v10 = vsel %vm254_vm2, %v443_v63, %v442_v6  ;;  %v1906_v63 = vld [vmem:[#allocation14 + $0x18] sm:$0xff]  ;;  %v1908_v4 = vld [vmem:[#allocation14 + $0x10] sm:$0xff]  ;;  %v1911_v6 = vld [vmem:[#allocation14 + $0x8] sm:$0xff] }
 0x327   :  { %v315_v11 = vrot.slane %v314_v7, 4  ;;  %v308_v12 = vrot.slane %v307_v8, 4  ;;  %446 = vst.msk [vmem:[#allocation17] sm:$0x3] %vm257_vm3, %v444_v10  ;;  %408 = vmatpush.msra.mxu3 %v1906_v63 }
 0x329   :  { %v316_v14 = vadd.f32 %v315_v11, %v314_v7  ;;  %v309_v15 = vadd.f32 %v308_v12, %v307_v8  ;;  %409 = vmatpush.msra.mxu3 %v1908_v4  ;;  %v1914_v7 = vld [vmem:[#allocation14] sm:$0xff] }
 0x32b   :  { %v317_v16 = vrot.slane %v316_v14, 2  ;;  %v310_v17 = vrot.slane %v309_v15, 2  ;;  %410 = vmatpush.msra.mxu3 %v1911_v6 }
 0x32d   :  { %v318_v18 = vadd.f32 %v317_v16, %v316_v14  ;;  %v311_v19 = vadd.f32 %v310_v17, %v309_v15  ;;  %411 = vmatpush.msra.mxu3 %v1914_v7 }
 0x32f   :  { %v312_v20 = vrot.slane %v311_v19, 1  ;;  %v319_v21 = vrot.slane %v318_v18, 1  ;;  %657 = vmatpush.msrb.mxu3 %v1906_v63 }
 0x331   :  { %v313_v23 = vadd.f32 %v312_v20, %v311_v19  ;;  %v320_v24 = vadd.f32 %v319_v21, %v318_v18  ;;  %658 = vmatpush.msrb.mxu3 %v1908_v4 }
 0x333   :  { %v324_v25 = vsel %vm254_vm2, %v320_v24, %v313_v23  ;;  %659 = vmatpush.msrb.mxu3 %v1911_v6 }
 0x334   :  { %1266 = vmatmul.msk.f32.vlgmr.msra.gmra.mxu2 %vm182_vm0, %v324_v25 }
 0x335   :  { %843 = vmatpush.msra.mxu2 %v1843_v50  ;;  %660 = vmatpush.msrb.mxu3 %v1914_v7 }
 0x337   :  { %844 = vmatpush.msra.mxu2 %v1845_v51 }
 0x339   :  { %845 = vmatpush.msra.mxu2 %v1848_v52 }
 0x33b   :  { %846 = vmatpush.msra.mxu2 %v1851_v53 }
 0x3b7   :  { %v344_v27 = vpop.f32.mrf.mxu2 }
 0x3b8   :  { %v347_v29 = vadd.f32 %v344_v27, %v321_v26 }
 0x3ba   :  { %v348_v30 = vadd.f32 %v347_v29, %v203_v28 }
 0x3bc   :  { %1319 = vtanh.f32 %v348_v30  ;;  %v1267_v33 = vmul.f32 -1.442695, %v348_v30 }
 0x3be   :  { %1321 = vpow2.f32 %v1267_v33 }
 0x3c2   :  { %v1320_v31 = vpop.eup %1319 }
 0x3c3   :  { %375 = vrot.lane.b32.xlu1 %v1320_v31, %s1690_s7 }
 0x3c4   :  { %v1322_v34 = vpop.eup %1321 }
 0x3c5   :  { %v352_v35 = vadd.f32 1.0, %v1322_v34 }
 0x3c7   :  { %1323 = vrcp.f32 %v352_v35  ;;  %v364_v41 = vand.u32 2147483648, %v352_v35  ;;  %vm358_vm5 = vweird.f32 %v352_v35  ;;  %v362_v42 = vand.u32 2147483647, %v352_v35 }
 0x3c9   :  { %v365_v44 = vor.u32 1.1754944e-38, %v364_v41  ;;  %vm363_vm7 = vcmp.eq.f32.partialorder %v362_v42, 8.507059e+37 }
 0x3cb   :  { %370 = vrot.lane.b32.xlu1 %v181_v32, %s1683_s20 }
 0x3cd   :  { %v1324_v36 = vpop.eup %1323 }
 0x3ce   :  { %v354_v37 = vmul.f32 %v1324_v36, %v352_v35  ;;  %vm359_vm4 = vweird.f32 %v1324_v36 }
 0x3cf   :  { %vm360_vm6 = vmor %vm358_vm5, %vm359_vm4 }
 0x3d0   :  { %v355_v38 = vsub.f32 1.0, %v354_v37 }
 0x3d2   :  { %v356_v39 = vmul.f32 %v1324_v36, %v355_v38 }
 0x3d4   :  { %v357_v40 = vadd.f32 %v1324_v36, %v356_v39 }
 0x3d6   :  { %v361_v43 = vsel %vm360_vm6, %v1324_v36, %v357_v40 }
 0x3d7   :  { %v366_v46 = vsel %vm363_vm7, %v365_v44, %v361_v43 }
 0x435   :  { %v376_v45 = vpop.permute.xlu1 %375 }
 0x436   :  { %v378_v47 = vmul.f32 %v376_v45, %v366_v46 }
 0x438   :  { %380 = vrot.lane.b32.xlu2 %v378_v47, %s1683_s20 }
 0x43d   :  { %v371_v48 = vpop.permute.xlu1 %370 }
 0x43e   :  { %v373_v49 = vmul.f32 %v371_v48, %v366_v46 }
 0x492   :  { %v381_v60 = vpop.permute.xlu2 %380 }
 0x493   :  { %v1902_v61 = vadd.f32 %v381_v60, %v373_v49 }
 0x495   :  { %1325 = vtanh.f32 %v1902_v61 }
 0x49b   :  { %v1326_v62 = vpop.eup %1325 }
 0x49c   :  { %386 = vrot.lane.b32.xlu0 %v1326_v62, %s1690_s7 }
 0x50e   :  { %v387_v8 = vpop.permute.xlu0 %386 }
 0x50f   :  { %v389_v10 = vmul.f32 %v387_v8, %v366_v46 }
 0x511   :  { %392 = vrot.lane.b32.xlu1 %v389_v10, %s1683_s20 }
 0x583   :  { %v393_v11 = vpop.permute.xlu1 %392 }
 0x584   :  { %1268 = vmatmul.msk.f32.vlgmr.msra.gmra.mxu3 %vm182_vm0, %v393_v11  ;;  %1269 = vmatmul.msk.f32.vlgmr.msrb.gmra.mxu0 %vm182_vm0, %v393_v11 }
 0x585   :  { %1270 = vmatmul.msk.f32.vlgmr.msrb.gmra.mxu1 %vm182_vm0, %v393_v11  ;;  %907 = vmatpush.msra.mxu3 %v1906_v63 }
 0x586   :  { %979 = vmatpush.msrb.mxu1 %v1794_v0  ;;  %959 = vmatpush.msrb.mxu0 %v1855_v54 }
 0x587   :  { %908 = vmatpush.msra.mxu3 %v1908_v4 }
 0x588   :  { %980 = vmatpush.msrb.mxu1 %v1796_v1  ;;  %960 = vmatpush.msrb.mxu0 %v1857_v55 }
 0x589   :  { %909 = vmatpush.msra.mxu3 %v1911_v6 }
 0x58a   :  { %981 = vmatpush.msrb.mxu1 %v1799_v2  ;;  %961 = vmatpush.msrb.mxu0 %v1861_v56 }
 0x58b   :  { %910 = vmatpush.msra.mxu3 %v1914_v7 }
 0x58c   :  { %982 = vmatpush.msrb.mxu1 %v1802_v3  ;;  %962 = vmatpush.msrb.mxu0 %v1865_v57 }
 0x602   :  { %v484_v0 = vpop.f32.mrf.mxu1 }
 0x603   :  { %v488_v54 = vrot.slane %v484_v0, 1  ;;  %v489_v12 = vperm.slane %v484_v0, 0 }
 0x605   :  { %v490_v14 = vperm.slane %v488_v54, 0  ;;  %v493_v1 = vadd.f32 %v489_v12, %v1818_v5 }
 0x607   :  { %v494_v55 = vadd.f32 %v490_v14, %v1820_v9  ;;  %1327 = vtanh.f32 %v493_v1 }
 0x609   :  { %1329 = vtanh.f32 %v494_v55 }
 0x60d   :  { %v1328_v15 = vpop.eup %1327 }
 0x60e   :  { %v497_v2 = vmul.f32 %v1328_v15, %v1827_v13 }
 0x60f   :  { %v1330_v56 = vpop.eup %1329 }
 0x610   :  { %v499_v16 = vsel %vm241_vm1, %v497_v2, 0.0  ;;  %v498_v3 = vmul.f32 %v1330_v56, %v1827_v13 }
 0x611   :  { %500 = vadd.xlane.f32.xlu0 %v499_v16 }
 0x612   :  { %v502_v57 = vsel %vm241_vm1, %v498_v3, 0.0 }
 0x613   :  { %503 = vadd.xlane.f32.xlu1 %v502_v57 }
 0x684   :  { %v501_v17 = vpop.xlane.xlu0 %500 }
 0x685   :  { %v507_v19 = vperm.slane %v501_v17, %v1833_v22 }
 0x686   :  { %v504_v18 = vpop.xlane.xlu1 %503 }
 0x687   :  { %v508_v20 = vperm.slane %v504_v18, %v1833_v22 }
 0x689   :  { %v509_v21 = vsel %vm254_vm2, %v508_v20, %v507_v19  ;;  %v464_v20 = vpop.f32.mrf.mxu0 }
 0x68a   :  { %v511_v23 = vsel %vm257_vm3, %v509_v21, -inf }
 0x68b   :  { %512 = vmax.xlane.f32.xlu2 %v511_v23 }
 0x6fe   :  { %v513_v24 = vpop.xlane.xlu2 %512 }
 0x6ff   :  { %v515_v25 = vperm.slane %v513_v24, 0  ;;  %v516_v26 = vperm.slane %v513_v24, 1 }
 0x701   :  { %v519_v27 = vsub.f32 %v501_v17, %v515_v25  ;;  %v520_v28 = vsub.f32 %v504_v18, %v516_v26  ;;  %v575_v17 = vld [vmem:[#allocation2 + $0x2] sm:$0x3] }
 0x703   :  { %v521_v29 = vmul.f32 1.442695, %v519_v27  ;;  %v523_v30 = vmul.f32 1.442695, %v520_v28 }
 0x705   :  { %1331 = vpow2.f32 %v521_v29 }
 0x706   :  { %1333 = vpow2.f32 %v523_v30 }
 0x70b   :  { %v1332_v31 = vpop.eup %1331 }
 0x70c   :  { %v1334_v32 = vpop.eup %1333  ;;  %528 = vperm.xlu0 %1306, %v1332_v31  }
 0x70d   :  { %531 = vperm.xlu1 %1304, %v1334_v32  }
 0x77e   :  { %v529_v33 = vpop.permute.xlu0 %528 }
 0x77f   :  { %v532_v34 = vpop.permute.xlu1 %531  ;;  %v533_v35 = vperm.slane %v529_v33, %v1833_v22 }
 0x780   :  { %v534_v36 = vperm.slane %v532_v34, %v1833_v22 }
 0x782   :  { %v535_v37 = vsel %vm254_vm2, %v534_v36, %v533_v35 }
 0x783   :  { %v537_v38 = vsel %vm257_vm3, %v535_v37, 0.0 }
 0x784   :  { %538 = vadd.xlane.f32.xlu2 %v537_v38 }
 0x7f7   :  { %v539_v39 = vpop.xlane.xlu2 %538 }
 0x7f8   :  { %1335 = vrcp.f32 %v539_v39 }
 0x7fe   :  { %v1336_v40 = vpop.eup %1335 }
 0x7ff   :  { %v543_v41 = vperm.slane %v1336_v40, 1  ;;  %v542_v42 = vperm.slane %v1336_v40, 0 }
 0x801   :  { %v547_v43 = vmul.f32 %v1334_v32, %v543_v41  ;;  %v546_v44 = vmul.f32 %v1332_v31, %v542_v42 }
 0x803   :  { %555 = vperm.xlu0 %1306, %v547_v43   ;;  %550 = vperm.xlu2 %1305, %v546_v44  }
 0x85d   :  { %v551_v45 = vpop.permute.xlu2 %550 }
 0x85e   :  { %v558_v46 = vmul.f32 %v551_v45, %v1877_v59  ;;  %v691_v62 = vperm.slane %v551_v45, %v1833_v22 }
 0x860   :  { %v560_v47 = vsel %vm182_vm0, %v558_v46, 0.0 }
 0x861   :  { %v561_v48 = vrot.slane %v560_v47, 4 }
 0x863   :  { %v562_v49 = vadd.f32 %v561_v48, %v560_v47 }
 0x865   :  { %v563_v11 = vrot.slane %v562_v49, 2 }
 0x867   :  { %v564_v14 = vadd.f32 %v563_v11, %v562_v49 }
 0x869   :  { %v565_v15 = vrot.slane %v564_v14, 1 }
 0x86b   :  { %v566_v16 = vadd.f32 %v565_v15, %v564_v14 }
 0x875   :  { %v556_v60 = vpop.permute.xlu0 %555 }
 0x876   :  { %v559_v8 = vmul.f32 %v556_v60, %v1875_v58  ;;  %v692_v10 = vperm.slane %v556_v60, %v1833_v22 }
 0x878   :  { %v567_v0 = vsel %vm182_vm0, %v559_v8, 0.0  ;;  %v693_v54 = vsel %vm254_vm2, %v692_v10, %v691_v62 }
 0x879   :  { %v568_v12 = vrot.slane %v567_v0, 4  ;;  %696 = vst.msk [vmem:[#allocation17 + $0x2] sm:$0x3] %vm257_vm3, %v693_v54 }
 0x87b   :  { %v569_v1 = vadd.f32 %v568_v12, %v567_v0 }
 0x87d   :  { %v570_v55 = vrot.slane %v569_v1, 2 }
 0x87f   :  { %v571_v2 = vadd.f32 %v570_v55, %v569_v1 }
 0x881   :  { %v572_v56 = vrot.slane %v571_v2, 1 }
 0x883   :  { %v573_v3 = vadd.f32 %v572_v56, %v571_v2 }
 0x885   :  { %v578_v57 = vsel %vm254_vm2, %v573_v3, %v566_v16 }
 0x886   :  { %1271 = vmatmul.msk.f32.vlgmr.msrb.gmra.mxu2 %vm182_vm0, %v578_v57 }
 0x887   :  { %1093 = vmatpush.msrb.mxu2 %v1843_v50 }
 0x889   :  { %1094 = vmatpush.msrb.mxu2 %v1845_v51 }
 0x88b   :  { %1095 = vmatpush.msrb.mxu2 %v1848_v52 }
 0x88d   :  { %1096 = vmatpush.msrb.mxu2 %v1851_v53 }
 0x909   :  { %v598_v18 = vpop.f32.mrf.mxu2 }
 0x90a   :  { %v601_v19 = vadd.f32 %v598_v18, %v575_v17 }
 0x90c   :  { %v602_v21 = vadd.f32 %v601_v19, %v464_v20 }
 0x90e   :  { %1337 = vtanh.f32 %v602_v21  ;;  %v1272_v24 = vmul.f32 -1.442695, %v602_v21 }
 0x910   :  { %1339 = vpow2.f32 %v1272_v24 }
 0x914   :  { %v1338_v23 = vpop.eup %1337 }
 0x915   :  { %625 = vrot.lane.b32.xlu1 %v1338_v23, %s1690_s7 }
 0x916   :  { %v1340_v25 = vpop.eup %1339 }
 0x917   :  { %v606_v26 = vadd.f32 1.0, %v1340_v25 }
 0x919   :  { %1341 = vrcp.f32 %v606_v26  ;;  %v618_v53 = vand.u32 2147483648, %v606_v26  ;;  %vm612_vm9 = vweird.f32 %v606_v26  ;;  %v616_v29 = vand.u32 2147483647, %v606_v26 }
 0x91b   :  { %v619_v31 = vor.u32 1.1754944e-38, %v618_v53  ;;  %vm617_vm11 = vcmp.eq.f32.partialorder %v616_v29, 8.507059e+37 }
 0x91f   :  { %v1342_v50 = vpop.eup %1341 }
 0x920   :  { %v608_v51 = vmul.f32 %v1342_v50, %v606_v26  ;;  %vm613_vm8 = vweird.f32 %v1342_v50 }
 0x921   :  { %vm614_vm10 = vmor %vm612_vm9, %vm613_vm8 }
 0x922   :  { %v609_v27 = vsub.f32 1.0, %v608_v51 }
 0x924   :  { %v610_v52 = vmul.f32 %v1342_v50, %v609_v27 }
 0x926   :  { %v611_v28 = vadd.f32 %v1342_v50, %v610_v52 }
 0x928   :  { %v615_v30 = vsel %vm614_vm10, %v1342_v50, %v611_v28  ;;  %vm1198_vm10 = vcmask 254976  }
 0x929   :  { %v620_v33 = vsel %vm617_vm11, %v619_v31, %v615_v30 }
 0x92a   :  { %v623_v35 = vmul.f32 %v620_v33, %v1902_v61 }
 0x987   :  { %v626_v32 = vpop.permute.xlu1 %625 }
 0x988   :  { %v628_v34 = vmul.f32 %v626_v32, %v620_v33 }
 0x98a   :  { %630 = vrot.lane.b32.xlu0 %v628_v34, %s1683_s20 }
 0x9fc   :  { %v631_v36 = vpop.permute.xlu0 %630 }
 0x9fd   :  { %v1969_v37 = vadd.f32 %v631_v36, %v623_v35 }
 0x9ff   :  { %1343 = vtanh.f32 %v1969_v37 }
 0xa05   :  { %v1344_v38 = vpop.eup %1343 }
 0xa06   :  { %636 = vrot.lane.b32.xlu1 %v1344_v38, %s1690_s7 }
 0xa78   :  { %v637_v39 = vpop.permute.xlu1 %636 }
 0xa79   :  { %v639_v40 = vmul.f32 %v637_v39, %v620_v33 }
 0xa7b   :  { %641 = vrot.lane.b32.xlu0 %v639_v40, %s1683_s20 }
 0xaed   :  { %v642_v41 = vpop.permute.xlu0 %641 }
 0xaee   :  { %1273 = vmatmul.msk.f32.vlgmr.msrb.gmra.mxu3 %vm182_vm0, %v642_v41  ;;  %1274 = vmatmul.msk.f32.vlgmr.msra.gmra.mxu0 %vm182_vm0, %v642_v41 }
 0xaef   :  { %1275 = vmatmul.msk.f32.vlgmr.msra.gmra.mxu1 %vm182_vm0, %v642_v41  ;;  %1157 = vmatpush.msrb.mxu3 %v1906_v63 }
 0xaf1   :  { %1158 = vmatpush.msrb.mxu3 %v1908_v4 }
 0xaf3   :  { %1159 = vmatpush.msrb.mxu3 %v1911_v6 }
 0xaf5   :  { %1160 = vmatpush.msrb.mxu3 %v1914_v7 }
 0xb6c   :  { %v734_v61 = vpop.f32.mrf.mxu1 }
 0xb6d   :  { %v738_v42 = vrot.slane %v734_v61, 1  ;;  %v739_v43 = vperm.slane %v734_v61, 0 }
 0xb6f   :  { %v740_v44 = vperm.slane %v738_v42, 0  ;;  %v743_v45 = vadd.f32 %v739_v43, %v1818_v5 }
 0xb71   :  { %v744_v46 = vadd.f32 %v740_v44, %v1820_v9  ;;  %1345 = vtanh.f32 %v743_v45  ;;  %v825_v45 = vld [vmem:[#allocation2 + $0x4] sm:$0x3] }
 0xb73   :  { %1347 = vtanh.f32 %v744_v46 }
 0xb77   :  { %v1346_v47 = vpop.eup %1345 }
 0xb78   :  { %v747_v48 = vmul.f32 %v1346_v47, %v1827_v13 }
 0xb79   :  { %v1348_v63 = vpop.eup %1347 }
 0xb7a   :  { %v749_v4 = vsel %vm241_vm1, %v747_v48, 0.0  ;;  %v748_v6 = vmul.f32 %v1348_v63, %v1827_v13  ;;  %v714_v48 = vpop.f32.mrf.mxu0 }
 0xb7b   :  { %750 = vadd.xlane.f32.xlu2 %v749_v4 }
 0xb7c   :  { %v752_v7 = vsel %vm241_vm1, %v748_v6, 0.0 }
 0xb7d   :  { %753 = vadd.xlane.f32.xlu1 %v752_v7 }
 0xbee   :  { %v751_v49 = vpop.xlane.xlu2 %750 }
 0xbef   :  { %v757_v62 = vperm.slane %v751_v49, %v1833_v22 }
 0xbf0   :  { %v754_v60 = vpop.xlane.xlu1 %753 }
 0xbf1   :  { %v758_v8 = vperm.slane %v754_v60, %v1833_v22 }
 0xbf3   :  { %v759_v10 = vsel %vm254_vm2, %v758_v8, %v757_v62 }
 0xbf4   :  { %v761_v11 = vsel %vm257_vm3, %v759_v10, -inf }
 0xbf5   :  { %762 = vmax.xlane.f32.xlu0 %v761_v11 }
 0xc68   :  { %v763_v0 = vpop.xlane.xlu0 %762 }
 0xc69   :  { %v765_v54 = vperm.slane %v763_v0, 0  ;;  %v766_v12 = vperm.slane %v763_v0, 1 }
 0xc6b   :  { %v769_v14 = vsub.f32 %v751_v49, %v765_v54  ;;  %v770_v1 = vsub.f32 %v754_v60, %v766_v12 }
 0xc6d   :  { %v771_v55 = vmul.f32 1.442695, %v769_v14  ;;  %v773_v15 = vmul.f32 1.442695, %v770_v1 }
 0xc6f   :  { %1349 = vpow2.f32 %v771_v55 }
 0xc70   :  { %1351 = vpow2.f32 %v773_v15 }
 0xc75   :  { %v1350_v2 = vpop.eup %1349 }
 0xc76   :  { %v1352_v56 = vpop.eup %1351  ;;  %778 = vperm.xlu2 %1305, %v1350_v2  }
 0xc77   :  { %781 = vperm.xlu1 %1304, %v1352_v56  }
 0xcd0   :  { %v779_v16 = vpop.permute.xlu2 %778 }
 0xcd1   :  { %v783_v57 = vperm.slane %v779_v16, %v1833_v22 }
 0xce9   :  { %v782_v3 = vpop.permute.xlu1 %781 }
 0xcea   :  { %v784_v17 = vperm.slane %v782_v3, %v1833_v22 }
 0xcec   :  { %v785_v18 = vsel %vm254_vm2, %v784_v17, %v783_v57 }
 0xced   :  { %v787_v19 = vsel %vm257_vm3, %v785_v18, 0.0 }
 0xcee   :  { %788 = vadd.xlane.f32.xlu0 %v787_v19 }
 0xd61   :  { %v789_v20 = vpop.xlane.xlu0 %788 }
 0xd62   :  { %1353 = vrcp.f32 %v789_v20 }
 0xd68   :  { %v1354_v21 = vpop.eup %1353 }
 0xd69   :  { %v793_v23 = vperm.slane %v1354_v21, 1  ;;  %v792_v24 = vperm.slane %v1354_v21, 0 }
 0xd6b   :  { %v797_v25 = vmul.f32 %v1352_v56, %v793_v23  ;;  %v796_v26 = vmul.f32 %v1350_v2, %v792_v24 }
 0xd6d   :  { %805 = vperm.xlu2 %1305, %v797_v25   ;;  %800 = vperm.xlu0 %1306, %v796_v26  }
 0xdc7   :  { %v806_v50 = vpop.permute.xlu2 %805 }
 0xdc8   :  { %v809_v51 = vmul.f32 %v806_v50, %v1875_v58  ;;  %v942_v29 = vperm.slane %v806_v50, %v1833_v22 }
 0xdca   :  { %v817_v27 = vsel %vm182_vm0, %v809_v51, 0.0 }
 0xdcb   :  { %v818_v52 = vrot.slane %v817_v27, 4 }
 0xdcd   :  { %v819_v28 = vadd.f32 %v818_v52, %v817_v27 }
 0xdcf   :  { %v820_v32 = vrot.slane %v819_v28, 2 }
 0xdd1   :  { %v821_v36 = vadd.f32 %v820_v32, %v819_v28 }
 0xdd3   :  { %v822_v40 = vrot.slane %v821_v36, 1 }
 0xdd5   :  { %v823_v42 = vadd.f32 %v822_v40, %v821_v36 }
 0xddf   :  { %v801_v53 = vpop.permute.xlu0 %800 }
 0xde0   :  { %v808_v30 = vmul.f32 %v801_v53, %v1877_v59  ;;  %v941_v31 = vperm.slane %v801_v53, %v1833_v22 }
 0xde2   :  { %v810_v33 = vsel %vm182_vm0, %v808_v30, 0.0  ;;  %v943_v34 = vsel %vm254_vm2, %v942_v29, %v941_v31 }
 0xde3   :  { %v811_v35 = vrot.slane %v810_v33, 4  ;;  %946 = vst.msk [vmem:[#allocation17 + $0x4] sm:$0x3] %vm257_vm3, %v943_v34 }
 0xde5   :  { %v812_v38 = vadd.f32 %v811_v35, %v810_v33 }
 0xde7   :  { %v813_v39 = vrot.slane %v812_v38, 2 }
 0xde9   :  { %v814_v41 = vadd.f32 %v813_v39, %v812_v38 }
 0xdeb   :  { %v815_v61 = vrot.slane %v814_v41, 1 }
 0xded   :  { %v816_v43 = vadd.f32 %v815_v61, %v814_v41 }
 0xdef   :  { %v828_v44 = vsel %vm254_vm2, %v823_v42, %v816_v43 }
 0xdf0   :  { %1276 = vmatmul.msk.f32.vlgmr.msra.gmra.mxu2 %vm182_vm0, %v828_v44 }
 0xe73   :  { %v848_v46 = vpop.f32.mrf.mxu2 }
 0xe74   :  { %v851_v47 = vadd.f32 %v848_v46, %v825_v45 }
 0xe76   :  { %v852_v63 = vadd.f32 %v851_v47, %v714_v48 }
 0xe78   :  { %1355 = vtanh.f32 %v852_v63  ;;  %v1277_v6 = vmul.f32 -1.442695, %v852_v63 }
 0xe7a   :  { %1357 = vpow2.f32 %v1277_v6  ;;  %v2030_v6 = vld [vmem:[#allocation14 + $0x20] ss:$0 sm:$0xff] }
 0xe7e   :  { %v1356_v4 = vpop.eup %1355 }
 0xe7f   :  { %875 = vrot.lane.b32.xlu1 %v1356_v4, %s1690_s7 }
 0xe80   :  { %v1358_v7 = vpop.eup %1357 }
 0xe81   :  { %v856_v49 = vadd.f32 1.0, %v1358_v7  ;;  %v413_v7 = vpop.f32.mrf.mxu3 }
 0xe83   :  { %1359 = vrcp.f32 %v856_v49  ;;  %v868_v0 = vand.u32 2147483648, %v856_v49  ;;  %vm862_vm13 = vweird.f32 %v856_v49  ;;  %v866_v54 = vand.u32 2147483647, %v856_v49 }
 0xe85   :  { %v869_v14 = vor.u32 1.1754944e-38, %v868_v0  ;;  %vm867_vm15 = vcmp.eq.f32.partialorder %v866_v54, 8.507059e+37 }
 0xe89   :  { %v1360_v60 = vpop.eup %1359 }
 0xe8a   :  { %v858_v62 = vmul.f32 %v1360_v60, %v856_v49  ;;  %vm863_vm12 = vweird.f32 %v1360_v60  ;;  %v2033_v49 = vadd.f32 %v2030_v6, %v413_v7 }
 0xe8b   :  { %vm864_vm14 = vmor %vm862_vm13, %vm863_vm12 }
 0xe8c   :  { %v859_v8 = vsub.f32 1.0, %v858_v62 }
 0xe8e   :  { %v860_v10 = vmul.f32 %v1360_v60, %v859_v8 }
 0xe90   :  { %v861_v11 = vadd.f32 %v1360_v60, %v860_v10 }
 0xe92   :  { %v865_v12 = vsel %vm864_vm14, %v1360_v60, %v861_v11 }
 0xe93   :  { %v870_v55 = vsel %vm867_vm15, %v869_v14, %v865_v12 }
 0xe94   :  { %v873_v2 = vmul.f32 %v870_v55, %v1969_v37 }
 0xef1   :  { %v876_v1 = vpop.permute.xlu1 %875 }
 0xef2   :  { %v878_v15 = vmul.f32 %v876_v1, %v870_v55 }
 0xef4   :  { %880 = vrot.lane.b32.xlu2 %v878_v15, %s1683_s20 }
 0xf4e   :  { %v881_v56 = vpop.permute.xlu2 %880 }
 0xf4f   :  { %v2008_v16 = vadd.f32 %v881_v56, %v873_v2 }
 0xf51   :  { %1361 = vtanh.f32 %v2008_v16 }
 0xf57   :  { %v1362_v3 = vpop.eup %1361 }
 0xf58   :  { %886 = vrot.lane.b32.xlu0 %v1362_v3, %s1690_s7 }
 0xfca   :  { %v887_v57 = vpop.permute.xlu0 %886 }
 0xfcb   :  { %v889_v17 = vmul.f32 %v887_v57, %v870_v55 }
 0xfcd   :  { %891 = vrot.lane.b32.xlu1 %v889_v17, %s1683_s20 }
0x103f   :  { %v892_v18 = vpop.permute.xlu1 %891 }
0x1040   :  { %1278 = vmatmul.msk.f32.vlgmr.msra.gmra.mxu3 %vm182_vm0, %v892_v18  ;;  %1279 = vmatmul.msk.f32.vlgmr.msrb.gmra.mxu0 %vm182_vm0, %v892_v18 }
0x1041   :  { %1280 = vmatmul.msk.f32.vlgmr.msrb.gmra.mxu1 %vm182_vm0, %v892_v18 }
0x10be   :  { %v984_v37 = vpop.f32.mrf.mxu1 }
0x10bf   :  { %v988_v19 = vrot.slane %v984_v37, 1  ;;  %v989_v20 = vperm.slane %v984_v37, 0 }
0x10c1   :  { %v990_v21 = vperm.slane %v988_v19, 0  ;;  %v993_v23 = vadd.f32 %v989_v20, %v1818_v5  ;;  %v1075_v20 = vld [vmem:[#allocation2 + $0x6] sm:$0x3] }
0x10c3   :  { %v994_v24 = vadd.f32 %v990_v21, %v1820_v9  ;;  %1363 = vtanh.f32 %v993_v23 }
0x10c5   :  { %1365 = vtanh.f32 %v994_v24  ;;  %v964_v24 = vpop.f32.mrf.mxu0 }
0x10c9   :  { %v1364_v25 = vpop.eup %1363 }
0x10ca   :  { %v997_v26 = vmul.f32 %v1364_v25, %v1827_v13 }
0x10cb   :  { %v1366_v50 = vpop.eup %1365 }
0x10cc   :  { %v999_v51 = vsel %vm241_vm1, %v997_v26, 0.0  ;;  %v998_v27 = vmul.f32 %v1366_v50, %v1827_v13 }
0x10cd   :  { %1000 = vadd.xlane.f32.xlu2 %v999_v51 }
0x10ce   :  { %v1002_v52 = vsel %vm241_vm1, %v998_v27, 0.0  ;;  %vm416_vm1 = vcmask 517120  }
0x10cf   :  { %1003 = vadd.xlane.f32.xlu0 %v1002_v52  ;;  %v417_v60 = vsel %vm416_vm1, %v2033_v49, -inf }
0x1140   :  { %v1001_v28 = vpop.xlane.xlu2 %1000 }
0x1141   :  { %v1007_v5 = vperm.slane %v1001_v28, %v1833_v22 }
0x1142   :  { %v1004_v53 = vpop.xlane.xlu0 %1003 }
0x1143   :  { %v1008_v9 = vperm.slane %v1004_v53, %v1833_v22 }
0x1145   :  { %v1009_v29 = vsel %vm254_vm2, %v1008_v9, %v1007_v5 }
0x1146   :  { %v1011_v30 = vsel %vm257_vm3, %v1009_v29, -inf }
0x1147   :  { %1012 = vmax.xlane.f32.xlu1 %v1011_v30 }
0x11ba   :  { %v1013_v31 = vpop.xlane.xlu1 %1012 }
0x11bb   :  { %v1015_v32 = vperm.slane %v1013_v31, 0  ;;  %v1016_v33 = vperm.slane %v1013_v31, 1 }
0x11bd   :  { %v1019_v34 = vsub.f32 %v1001_v28, %v1015_v32  ;;  %v1020_v13 = vsub.f32 %v1004_v53, %v1016_v33 }
0x11bf   :  { %v1021_v35 = vmul.f32 1.442695, %v1019_v34  ;;  %v1023_v36 = vmul.f32 1.442695, %v1020_v13 }
0x11c1   :  { %1367 = vpow2.f32 %v1021_v35 }
0x11c2   :  { %1369 = vpow2.f32 %v1023_v36 }
0x11c7   :  { %v1368_v38 = vpop.eup %1367 }
0x11c8   :  { %v1370_v39 = vpop.eup %1369  ;;  %1028 = vperm.xlu2 %1305, %v1368_v38  }
0x11c9   :  { %1031 = vperm.xlu0 %1306, %v1370_v39  }
0x1222   :  { %v1029_v40 = vpop.permute.xlu2 %1028 }
0x1223   :  { %v1033_v61 = vperm.slane %v1029_v40, %v1833_v22 }
0x123b   :  { %v1032_v41 = vpop.permute.xlu0 %1031 }
0x123c   :  { %v1034_v42 = vperm.slane %v1032_v41, %v1833_v22 }
0x123e   :  { %v1035_v43 = vsel %vm254_vm2, %v1034_v42, %v1033_v61  ;;  %v662_v61 = vpop.f32.mrf.mxu3 }
0x123f   :  { %v1037_v44 = vsel %vm257_vm3, %v1035_v43, 0.0  ;;  %v663_v43 = vadd.f32 %v2030_v6, %v662_v61 }
0x1240   :  { %1038 = vadd.xlane.f32.xlu1 %v1037_v44 }
0x1241   :  { %v665_v44 = vsel %vm416_vm1, %v663_v43, -inf }
0x12b3   :  { %v1039_v45 = vpop.xlane.xlu1 %1038 }
0x12b4   :  { %1371 = vrcp.f32 %v1039_v45 }
0x12ba   :  { %v1372_v46 = vpop.eup %1371 }
0x12bb   :  { %v1043_v47 = vperm.slane %v1372_v46, 1  ;;  %v1042_v48 = vperm.slane %v1372_v46, 0 }
0x12bd   :  { %v1047_v63 = vmul.f32 %v1370_v39, %v1043_v47  ;;  %v1046_v4 = vmul.f32 %v1368_v38, %v1042_v48  ;;  %v912_v48 = vpop.f32.mrf.mxu3 }
0x12bf   :  { %1055 = vperm.xlu0 %1306, %v1047_v63   ;;  %1050 = vperm.xlu1 %1304, %v1046_v4   ;;  %v913_v63 = vadd.f32 %v2030_v6, %v912_v48 }
0x12c1   :  { %v915_v4 = vsel %vm416_vm1, %v913_v63, -inf }
0x12e9   :  { %418 = vmax.xlane.f32.xlu1 %v417_v60 }
0x1331   :  { %v1056_v62 = vpop.permute.xlu0 %1055  ;;  %v1051_v8 = vpop.permute.xlu1 %1050 }
0x1332   :  { %v1059_v10 = vmul.f32 %v1056_v62, %v1875_v58  ;;  %v1192_v11 = vperm.slane %v1056_v62, %v1833_v22  ;;  %v1058_v0 = vmul.f32 %v1051_v8, %v1877_v59  ;;  %v1191_v54 = vperm.slane %v1051_v8, %v1833_v22 }
0x1334   :  { %v1067_v12 = vsel %vm182_vm0, %v1059_v10, 0.0  ;;  %v1060_v14 = vsel %vm182_vm0, %v1058_v0, 0.0  ;;  %v1193_v1 = vsel %vm254_vm2, %v1192_v11, %v1191_v54 }
0x1335   :  { %v1068_v55 = vrot.slane %v1067_v12, 4  ;;  %v1061_v15 = vrot.slane %v1060_v14, 4  ;;  %1196 = vst.msk [vmem:[#allocation17 + $0x6] sm:$0x3] %vm257_vm3, %v1193_v1 }
0x1336   :  { %1231 = dma.vmem_to_hbm [thread:$0]  %s1224_s19, 128, %s1226_s23, [#allocation18], %s1683_s20, %s1683_s20, %s1684_s21  }
0x1337   :  { %v1069_v2 = vadd.f32 %v1068_v55, %v1067_v12  ;;  %v1062_v56 = vadd.f32 %v1061_v15, %v1060_v14 }
0x1339   :  { %v1070_v3 = vrot.slane %v1069_v2, 2  ;;  %v1063_v58 = vrot.slane %v1062_v56, 2 }
0x133b   :  { %v1071_v57 = vadd.f32 %v1070_v3, %v1069_v2  ;;  %v1064_v17 = vadd.f32 %v1063_v58, %v1062_v56 }
0x133d   :  { %v1072_v18 = vrot.slane %v1071_v57, 1  ;;  %v1065_v59 = vrot.slane %v1064_v17, 1 }
0x133f   :  { %v1073_v37 = vadd.f32 %v1072_v18, %v1071_v57  ;;  %v1066_v22 = vadd.f32 %v1065_v59, %v1064_v17 }
0x1341   :  { %v1078_v19 = vsel %vm254_vm2, %v1073_v37, %v1066_v22 }
0x1342   :  { %1281 = vmatmul.msk.f32.vlgmr.msrb.gmra.mxu2 %vm182_vm0, %v1078_v19 }
0x135c   :  { %v419_v40 = vpop.xlane.xlu1 %418 }
0x135d   :  { %v420_v41 = vsub.f32 %v2033_v49, %v419_v40 }
0x135f   :  { %v421_v42 = vmul.f32 1.442695, %v420_v41 }
0x13c5   :  { %v1098_v21 = vpop.f32.mrf.mxu2 }
0x13c6   :  { %v1101_v23 = vadd.f32 %v1098_v21, %v1075_v20 }
0x13c8   :  { %v1102_v25 = vadd.f32 %v1101_v23, %v964_v24 }
0x13ca   :  { %1373 = vtanh.f32 %v1102_v25  ;;  %v1282_v50 = vmul.f32 -1.442695, %v1102_v25 }
0x13cc   :  { %1375 = vpow2.f32 %v1282_v50 }
0x13d0   :  { %v1374_v26 = vpop.eup %1373 }
0x13d1   :  { %1125 = vrot.lane.b32.xlu2 %v1374_v26, %s1690_s7 }
0x13d2   :  { %v1376_v51 = vpop.eup %1375 }
0x13d3   :  { %v1106_v27 = vadd.f32 1.0, %v1376_v51 }
0x13d5   :  { %1377 = vrcp.f32 %v1106_v27  ;;  %v1118_v29 = vand.u32 2147483648, %v1106_v27  ;;  %vm1112_vm3 = vweird.f32 %v1106_v27  ;;  %v1116_v30 = vand.u32 2147483647, %v1106_v27 }
0x13d7   :  { %v1119_v32 = vor.u32 1.1754944e-38, %v1118_v29  ;;  %vm1117_vm5 = vcmp.eq.f32.partialorder %v1116_v30, 8.507059e+37 }
0x13db   :  { %v1378_v52 = vpop.eup %1377 }
0x13dc   :  { %v1108_v28 = vmul.f32 %v1378_v52, %v1106_v27  ;;  %vm1113_vm2 = vweird.f32 %v1378_v52 }
0x13dd   :  { %vm1114_vm4 = vmor %vm1112_vm3, %vm1113_vm2 }
0x13de   :  { %v1109_v53 = vsub.f32 1.0, %v1108_v28 }
0x13e0   :  { %v1110_v5 = vmul.f32 %v1378_v52, %v1109_v53 }
0x13e2   :  { %v1111_v9 = vadd.f32 %v1378_v52, %v1110_v5 }
0x13e4   :  { %v1115_v31 = vsel %vm1114_vm4, %v1378_v52, %v1111_v9 }
0x13e5   :  { %v1120_v34 = vsel %vm1117_vm5, %v1119_v32, %v1115_v31 }
0x13e6   :  { %v1123_v35 = vmul.f32 %v1120_v34, %v2008_v16 }
0x142b   :  { %v1126_v33 = vpop.permute.xlu2 %1125 }
0x142c   :  { %v1128_v13 = vmul.f32 %v1126_v33, %v1120_v34 }
0x142e   :  { %1130 = vrot.lane.b32.xlu0 %v1128_v13, %s1683_s20 }
0x14a0   :  { %v1131_v36 = vpop.permute.xlu0 %1130 }
0x14a1   :  { %v1133_v38 = vadd.f32 %v1131_v36, %v1123_v35 }
0x14a3   :  { %1379 = vtanh.f32 %v1133_v38 }
0x14a4   :  { %1381 = vpow2.f32 %v421_v42 }
0x14a9   :  { %v1380_v39 = vpop.eup %1379 }
0x14aa   :  { %1136 = vrot.lane.b32.xlu2 %v1380_v39, %s1690_s7  ;;  %v1382_v45 = vpop.eup %1381 }
0x14ab   :  { %v423_v16 = vsel %vm416_vm1, %v1382_v45, 0.0 }
0x14d3   :  { %666 = vmax.xlane.f32.xlu2 %v665_v44 }
0x14db   :  { %424 = vadd.xlane.f32.xlu2 %v423_v16 }
0x1504   :  { %v1137_v46 = vpop.permute.xlu2 %1136 }
0x1505   :  { %v1139_v47 = vmul.f32 %v1137_v46, %v1120_v34 }
0x1507   :  { %1141 = vrot.lane.b32.xlu0 %v1139_v47, %s1683_s20 }
0x1531   :  { %916 = vmax.xlane.f32.xlu0 %v915_v4 }
0x1546   :  { %v667_v7 = vpop.xlane.xlu2 %666 }
0x1547   :  { %v668_v49 = vsub.f32 %v663_v43, %v667_v7 }
0x1549   :  { %v669_v60 = vmul.f32 1.442695, %v668_v49 }
0x154b   :  { %1383 = vpow2.f32 %v669_v60 }
0x154e   :  { %v425_v62 = vpop.xlane.xlu2 %424 }
0x154f   :  { %1385 = vrcp.f32 %v425_v62  ;;  %v437_v12 = vand.u32 2147483648, %v425_v62  ;;  %v435_v1 = vand.u32 2147483647, %v425_v62  ;;  %vm431_vm7 = vweird.f32 %v425_v62 }
0x1551   :  { %v1384_v8 = vpop.eup %1383  ;;  %v438_v15 = vor.u32 1.1754944e-38, %v437_v12  ;;  %vm436_vm9 = vcmp.eq.f32.partialorder %v435_v1, 8.507059e+37 }
0x1552   :  { %v671_v10 = vsel %vm416_vm1, %v1384_v8, 0.0 }
0x1553   :  { %672 = vadd.xlane.f32.xlu0 %v671_v10 }
0x1555   :  { %v1386_v11 = vpop.eup %1385 }
0x1556   :  { %v427_v0 = vmul.f32 %v1386_v11, %v425_v62  ;;  %vm432_vm6 = vweird.f32 %v1386_v11 }
0x1557   :  { %vm433_vm8 = vmor %vm431_vm7, %vm432_vm6 }
0x1558   :  { %v428_v54 = vsub.f32 1.0, %v427_v0 }
0x155a   :  { %v429_v14 = vmul.f32 %v1386_v11, %v428_v54 }
0x155c   :  { %v430_v55 = vadd.f32 %v1386_v11, %v429_v14 }
0x155e   :  { %v434_v2 = vsel %vm433_vm8, %v1386_v11, %v430_v55 }
0x155f   :  { %v439_v56 = vsel %vm436_vm9, %v438_v15, %v434_v2 }
0x1560   :  { %v440_v3 = vmul.f32 %v1382_v45, %v439_v56 }
0x1562   :  { %441 = vst.msk [vmem:[#allocation16] sm:$0x3] %vm416_vm1, %v440_v3 }
0x1567   :  { %1201 = vrot.lane.b32.xlu0 %v1133_v38, %s1691_s28 }
0x1579   :  { %v1142_v58 = vpop.permute.xlu0 %1141 }
0x157a   :  { %1199 = vst.msk [vmem:[#allocation19] sm:$0x3] %vm1198_vm10, %v1142_v58  ;;  %1283 = vmatmul.msk.f32.vlgmr.msrb.gmra.mxu3 %vm182_vm0, %v1142_v58 }
0x15a4   :  { %v917_v57 = vpop.xlane.xlu0 %916 }
0x15a5   :  { %v918_v51 = vsub.f32 %v913_v63, %v917_v57 }
0x15a7   :  { %v919_v27 = vmul.f32 1.442695, %v918_v51 }
0x15c6   :  { %v673_v17 = vpop.xlane.xlu0 %672 }
0x15c7   :  { %1387 = vrcp.f32 %v673_v17  ;;  %v685_v22 = vand.u32 2147483648, %v673_v17  ;;  %v683_v20 = vand.u32 2147483647, %v673_v17  ;;  %vm679_vm12 = vweird.f32 %v673_v17 }
0x15c8   :  { %1389 = vpow2.f32 %v919_v27 }
0x15c9   :  { %v686_v23 = vor.u32 1.1754944e-38, %v685_v22  ;;  %vm684_vm14 = vcmp.eq.f32.partialorder %v683_v20, 8.507059e+37 }
0x15cd   :  { %v1388_v18 = vpop.eup %1387 }
0x15ce   :  { %v675_v59 = vmul.f32 %v1388_v18, %v673_v17  ;;  %vm680_vm11 = vweird.f32 %v1388_v18  ;;  %v1390_v5 = vpop.eup %1389 }
0x15cf   :  { %vm681_vm13 = vmor %vm679_vm12, %vm680_vm11  ;;  %v921_v9 = vsel %vm416_vm1, %v1390_v5, 0.0 }
0x15d0   :  { %v676_v37 = vsub.f32 1.0, %v675_v59 }
0x15d2   :  { %v677_v19 = vmul.f32 %v1388_v18, %v676_v37 }
0x15d4   :  { %v678_v21 = vadd.f32 %v1388_v18, %v677_v19 }
0x15d6   :  { %v682_v24 = vsel %vm681_vm13, %v1388_v18, %v678_v21 }
0x15d7   :  { %v687_v25 = vsel %vm684_vm14, %v686_v23, %v682_v24 }
0x15d8   :  { %v688_v26 = vmul.f32 %v1384_v8, %v687_v25 }
0x15d9   :  { %v1202_v50 = vpop.permute.xlu0 %1201 }
0x15da   :  { %690 = vst.msk [vmem:[#allocation16 + $0x2] sm:$0x3] %vm416_vm1, %v688_v26 }
0x15db   :  { %1205 = vst.msk [vmem:[#allocation19 + $0x2] sm:$0x3] %vm1198_vm10, %v1202_v50 }
0x15dc   :  { %1244 = dma.vmem_to_hbm [thread:$0]  %s1237_s0, 64, %s1239_s26, [#allocation18], %s1683_s20, %s1683_s20, %s1684_s21  }
0x15fd   :  { %v1162_v52 = vpop.f32.mrf.mxu3 }
0x15fe   :  { %v1163_v28 = vadd.f32 %v2030_v6, %v1162_v52 }
0x1600   :  { %v1165_v53 = vsel %vm416_vm1, %v1163_v28, -inf }
0x1601   :  { %1166 = vmax.xlane.f32.xlu1 %v1165_v53 }
0x1609   :  { %922 = vadd.xlane.f32.xlu1 %v921_v9 }
0x1674   :  { %v1167_v29 = vpop.xlane.xlu1 %1166 }
0x1675   :  { %v1168_v30 = vsub.f32 %v1163_v28, %v1167_v29 }
0x1677   :  { %v1169_v31 = vmul.f32 1.442695, %v1168_v30 }
0x1679   :  { %1391 = vpow2.f32 %v1169_v31 }
0x167c   :  { %v923_v32 = vpop.xlane.xlu1 %922 }
0x167d   :  { %1393 = vrcp.f32 %v923_v32  ;;  %v935_v36 = vand.u32 2147483648, %v923_v32  ;;  %v933_v39 = vand.u32 2147483647, %v923_v32  ;;  %vm929_vm15 = vweird.f32 %v923_v32 }
0x167f   :  { %v1392_v33 = vpop.eup %1391  ;;  %v936_v41 = vor.u32 1.1754944e-38, %v935_v36  ;;  %vm934_vm3 = vcmp.eq.f32.partialorder %v933_v39, 8.507059e+37 }
0x1680   :  { %v1171_v34 = vsel %vm416_vm1, %v1392_v33, 0.0 }
0x1681   :  { %1172 = vadd.xlane.f32.xlu2 %v1171_v34 }
0x1683   :  { %v1394_v13 = vpop.eup %1393 }
0x1684   :  { %v925_v6 = vmul.f32 %v1394_v13, %v923_v32  ;;  %vm930_vm0 = vweird.f32 %v1394_v13 }
0x1685   :  { %vm931_vm2 = vmor %vm929_vm15, %vm930_vm0 }
0x1686   :  { %v926_v35 = vsub.f32 1.0, %v925_v6 }
0x1688   :  { %v927_v38 = vmul.f32 %v1394_v13, %v926_v35 }
0x168a   :  { %v928_v40 = vadd.f32 %v1394_v13, %v927_v38 }
0x168c   :  { %v932_v61 = vsel %vm931_vm2, %v1394_v13, %v928_v40 }
0x168d   :  { %v937_v42 = vsel %vm934_vm3, %v936_v41, %v932_v61 }
0x168e   :  { %v938_v43 = vmul.f32 %v1390_v5, %v937_v42 }
0x1690   :  { %940 = vst.msk [vmem:[#allocation16 + $0x4] sm:$0x3] %vm416_vm1, %v938_v43 }
0x16f4   :  { %v1173_v44 = vpop.xlane.xlu2 %1172 }
0x16f5   :  { %1395 = vrcp.f32 %v1173_v44  ;;  %v1185_v47 = vand.u32 2147483648, %v1173_v44  ;;  %v1183_v63 = vand.u32 2147483647, %v1173_v44  ;;  %vm1179_vm5 = vweird.f32 %v1173_v44 }
0x16f7   :  { %v1186_v7 = vor.u32 1.1754944e-38, %v1185_v47  ;;  %vm1184_vm7 = vcmp.eq.f32.partialorder %v1183_v63, 8.507059e+37 }
0x16fb   :  { %v1396_v45 = vpop.eup %1395 }
0x16fc   :  { %v1175_v16 = vmul.f32 %v1396_v45, %v1173_v44  ;;  %vm1180_vm4 = vweird.f32 %v1396_v45 }
0x16fd   :  { %vm1181_vm6 = vmor %vm1179_vm5, %vm1180_vm4 }
0x16fe   :  { %v1176_v46 = vsub.f32 1.0, %v1175_v16 }
0x1700   :  { %v1177_v48 = vmul.f32 %v1396_v45, %v1176_v46 }
0x1702   :  { %v1178_v4 = vadd.f32 %v1396_v45, %v1177_v48 }
0x1704   :  { %v1182_v49 = vsel %vm1181_vm6, %v1396_v45, %v1178_v4 }
0x1705   :  { %v1187_v60 = vsel %vm1184_vm7, %v1186_v7, %v1182_v49 }
0x1706   :  { %v1188_v62 = vmul.f32 %v1392_v33, %v1187_v60 }
0x1708   :  { %1190 = vst.msk [vmem:[#allocation16 + $0x6] sm:$0x3] %vm416_vm1, %v1188_v62 }
0x1709   :  { %1218 = dma.vmem_to_hbm [thread:$0]  %s1211_s1, 128, %s1213_s12, [#allocation4], %s1683_s20, %s1683_s20, %s1684_s21  }
0x170a   :  { %1671 = dma.done.wait [#allocation4], 128  }
0x170b   :  { %1672 = vsyncadd [#allocation4], 4294967168 }
0x170c   :  { %1673 = dma.done.wait [#allocation18], 192  }
0x170d   :  { %1674 = vsyncadd [#allocation18], 4294967104 }
0x170e   :  { %1257 = vsyncpa [#allocation3], 1 }
0x170f   :  { %1258 = vsyncpa [#allocation6], 1 }
0x1710   :  { %1259 = vsyncpa [#allocation9], 1 }
0x1711   :  { %1260 = vsyncpa [#allocation12], 1 }
0x1712   :  { %1261 = vsyncpa [#allocation15], 1 }
0x1713   :  { %1262 = vsyncpa [#allocation4], 1 }
0x1714   :  { %1263 = vsyncpa [#allocation18], 1 }

</bundles_post_ra>
